<compile_context>
chip_gen: v6e
topology: v6e:2x2x1
jax: 0.10.0
libtpu: 0.0.40
codegen_flags: <defaults>
</compile_context>

<pallas_src>
import math
import numpy as np
import jax
import jax.numpy as jnp
from jax.experimental import pallas as pl
from jax.experimental.pallas import tpu as pltpu

H, W = 24, 32          # small stand-in for the module's default img_shape=(180, 240)
LANE_TILE = 1024       # lane tile for the sparse-resample kernel (multiple of 128)


# ----------------------------------------------------------------------------
# Deterministic buffer construction (host-side glue, plain numpy)
# ----------------------------------------------------------------------------
def _hann(N):  # torch.hann_window(N, periodic=False)
    n = np.arange(N, dtype=np.float64)
    return 0.5 * (1.0 - np.cos(2.0 * np.pi * n / (N - 1)))


def apofield_mask(shape):
    aporad = int(min(shape) * 0.12)
    apos = _hann(aporad * 2)
    row = np.ones(shape[0], np.float64)
    cols = np.ones(shape[1], np.float64)
    row[:aporad] = apos[:aporad]
    row[-aporad:] = apos[-aporad:]
    cols[:aporad] = apos[:aporad]
    cols[-aporad:] = apos[-aporad:]
    apomask = np.ones(shape, dtype=bool)
    radius = aporad // 2
    if radius > 0:
        apomask[radius:-radius, radius:-radius] = False
    return np.outer(row, cols).astype(np.float32), apomask


def _gauss1d(ksize, sigma):  # cv2.getGaussianKernel semantics (given sigma)
    x = np.arange(ksize, dtype=np.float64) - (ksize - 1) / 2.0
    g = np.exp(-(x * x) / (2.0 * sigma * sigma))
    return (g / g.sum()).reshape(-1, 1)


def getGaussianHpf2d(shape, sigma):
    u = _gauss1d(shape[0], sigma)
    v = _gauss1d(shape[1], sigma)
    f = u @ v.T
    f = f / f.max()
    return (1.0 - f).astype(np.float32)


def getPolarMap(shape):
    logBase = (0.55 * shape[0]) ** (1.0 / shape[1])
    log = logBase ** np.arange(shape[1], dtype=np.float64)
    ang = -np.linspace(0.0, math.pi, shape[0])
    sampleY = np.outer(np.sin(ang), log) + shape[0] / 2.0
    sampleX = np.outer(np.cos(ang), log * shape[1] / shape[0]) + shape[1] / 2.0
    grid01 = np.stack([sampleX / (shape[1] - 1), sampleY / (shape[0] - 1)], 2)
    return (grid01 * 2.0 - 1.0).astype(np.float32)  # (H, W, 2); (x, y) in ~[-1, 1]


def build_bicubic_taps(grid, in_shape, filter2d):
    """Per-output-pixel 16 bicubic taps and weights reproducing
       F.grid_sample(|fftshift(fft2(x)) * filterG|, grid, mode='bicubic',
                     align_corners=True, padding_mode='zeros').
    The fftshift permutation is folded into the tap indices (so the kernel can
    gather directly from the un-shifted fft2 output) and filterG is folded into
    the tap weights (|z*f| == |z|*f for f >= 0)."""
    Hin, Win = in_shape
    Hout, Wout, _ = grid.shape
    A = -0.75

    def cc1(t):  # cubic_convolution1
        return ((A + 2.0) * t - (A + 3.0)) * t * t + 1.0

    def cc2(t):  # cubic_convolution2
        return ((A * t - 5.0 * A) * t + 8.0 * A) * t - 4.0 * A

    gx = grid[..., 0].astype(np.float64).reshape(-1)
    gy = grid[..., 1].astype(np.float64).reshape(-1)
    ix = (gx + 1.0) / 2.0 * (Win - 1)     # align_corners=True
    iy = (gy + 1.0) / 2.0 * (Hin - 1)
    x0 = np.floor(ix)
    y0 = np.floor(iy)
    tx = ix - x0
    ty = iy - y0
    x0 = x0.astype(np.int64)
    y0 = y0.astype(np.int64)
    wx = np.stack([cc2(tx + 1.0), cc1(tx), cc1(1.0 - tx), cc2(2.0 - tx)], 0)  # (4, N)
    wy = np.stack([cc2(ty + 1.0), cc1(ty), cc1(1.0 - ty), cc2(2.0 - ty)], 0)

    filt_flat = filter2d.reshape(-1).astype(np.float64)
    # fftshift as a flat permutation: shifted_flat[p] == unshifted_flat[perm[p]]
    perm = np.fft.fftshift(np.arange(Hin * Win).reshape(Hin, Win), axes=(0, 1)).reshape(-1)

    N = Hout * Wout
    idx = np.zeros((16, N), np.int32)
    w = np.zeros((16, N), np.float32)
    t = 0
    for i in range(4):
        yy = y0 + (i - 1)
        vy = (yy >= 0) & (yy < Hin)
        for j in range(4):
            xx = x0 + (j - 1)
            valid = vy & (xx >= 0) & (xx < Win)     # zeros padding: OOB taps contribute 0
            flat_shift = np.clip(yy, 0, Hin - 1) * Win + np.clip(xx, 0, Win - 1)
            wt = wy[i] * wx[j] * filt_flat[flat_shift]   # fold Gaussian HPF into weight
            w[t] = np.where(valid, wt, 0.0).astype(np.float32)
            idx[t] = perm[flat_shift].astype(np.int32)   # fold fftshift into index
            t += 1
    return idx, w


# ----------------------------------------------------------------------------
# Pallas kernels
# ----------------------------------------------------------------------------
def apodize_kernel(img_ref, apo_ref, maskn_ref, out_ref):
    # Single block over all B images; maskn = apomask / sum(apomask) (host-precomputed).
    img = img_ref[...]                                   # (B, H, W)
    apo = apo_ref[...]                                   # (H, W)
    maskn = maskn_ref[...]                               # (H, W)
    wsum = jnp.sum(img * maskn[None, :, :], axis=2, keepdims=True)   # (B, H, 1)
    mean = jnp.sum(wsum, axis=1, keepdims=True)                      # (B, 1, 1)
    out_ref[...] = img * apo[None, :, :] + mean * (1.0 - apo)[None, :, :]


def lp_resample_kernel(re_ref, im_ref, w_ref, out_ref):
    # Sparse bicubic log-polar resample fused with |spectrum| * Gaussian HPF:
    #   out[b, n] = sum_t w[t, n] * sqrt(re[b, t, n]^2 + im[b, t, n]^2)
    # (HPF + fftshift already folded into the host-built taps/weights.)
    re = re_ref[...]                                     # (B, 16, TN)
    im = im_ref[...]
    mag = jnp.sqrt(re * re + im * im)                    # EUP sqrt; VPU MACs
    out_ref[...] = jnp.sum(mag * w_ref[...][None, :, :], axis=1)     # (B, TN)


def xps_normalize_kernel(re_ref, im_ref, ore_ref, oim_ref):
    re = re_ref[...]
    im = im_ref[...]
    n = jnp.sqrt(jnp.sum(re * re + im * im, axis=1, keepdims=True))
    n = jnp.maximum(n, 1e-12)                            # F.normalize(p=2, dim=1, eps=1e-12)
    inv = 1.0 / n
    ore_ref[...] = re * inv
    oim_ref[...] = im * inv


# ----------------------------------------------------------------------------
# pallas_call wrappers
# ----------------------------------------------------------------------------
def apodize(img, apofield, apomask_norm):
    B, h, w = img.shape
    return pl.pallas_call(
        apodize_kernel,
        out_shape=jax.ShapeDtypeStruct((B, h, w), jnp.float32),
        grid=(1,),
        in_specs=[
            pl.BlockSpec((B, h, w), lambda i: (0, 0, 0)),
            pl.BlockSpec((h, w), lambda i: (0, 0)),
            pl.BlockSpec((h, w), lambda i: (0, 0)),
        ],
        out_specs=pl.BlockSpec((B, h, w), lambda i: (0, 0, 0)),
    )(img, apofield, apomask_norm)


def lp_resample(g_re, g_im, w):
    B, T, n_pad = g_re.shape
    tn = min(LANE_TILE, n_pad)
    assert n_pad % tn == 0 and tn % 128 == 0
    return pl.pallas_call(
        lp_resample_kernel,
        out_shape=jax.ShapeDtypeStruct((B, n_pad), jnp.float32),
        grid=(n_pad // tn,),
        in_specs=[
            pl.BlockSpec((B, T, tn), lambda n: (0, 0, n)),
            pl.BlockSpec((B, T, tn), lambda n: (0, 0, n)),
            pl.BlockSpec((T, tn), lambda n: (0, n)),
        ],
        out_specs=pl.BlockSpec((B, tn), lambda n: (0, n)),
        compiler_params=pltpu.CompilerParams(
            dimension_semantics=("parallel",)),      # independent N tiles -> v7x megacore
    )(g_re, g_im, w)


def xps_normalize(c_re, c_im):
    hr, w = c_re.shape
    return pl.pallas_call(
        xps_normalize_kernel,
        out_shape=(
            jax.ShapeDtypeStruct((hr, w), jnp.float32),
            jax.ShapeDtypeStruct((hr, w), jnp.float32),
        ),
        grid=(1,),
        in_specs=[
            pl.BlockSpec((hr, w), lambda i: (0, 0)),
            pl.BlockSpec((hr, w), lambda i: (0, 0)),
        ],
        out_specs=(
            pl.BlockSpec((hr, w), lambda i: (0, 0)),
            pl.BlockSpec((hr, w), lambda i: (0, 0)),
        ),
    )(c_re, c_im)


# ----------------------------------------------------------------------------
# Module equivalent
# ----------------------------------------------------------------------------
class MyModuleJax:
    def __init__(self, filterG_np, img_shape=(H, W)):
        h, w = img_shape
        apofield_np, apomask_np = apofield_mask(img_shape)
        polarmap_np = getPolarMap(img_shape)
        idx_np, w_np = build_bicubic_taps(polarmap_np, img_shape, filterG_np)

        n_out = h * w
        n_pad = int(math.ceil(n_out / LANE_TILE)) * LANE_TILE   # lane-dense, tileable
        idx_pad = np.zeros((16, n_pad), np.int32)
        w_pad = np.zeros((16, n_pad), np.float32)
        idx_pad[:, :n_out] = idx_np
        w_pad[:, :n_out] = w_np

        mask_f = apomask_np.astype(np.float64)
        self.apofield = jnp.asarray(apofield_np)
        self.apomask_norm = jnp.asarray((mask_f / mask_f.sum()).astype(np.float32))
        self.tap_idx = jnp.asarray(idx_pad)     # (16, n_pad) int32, fftshift folded in
        self.tap_w = jnp.asarray(w_pad)         # (16, n_pad) f32, Gaussian HPF folded in
        # TODO(synk): tap_w could be bf16 to halve its HBM traffic (perf review), kept
        #             f32 so the recovered angle matches the f32 reference exactly.
        self.img_shape = img_shape
        self.n_out = n_out
        # NOTE: PyTorch buffers `index` and `col` are never used in forward(); omitted.

    def logPolarNBatch(self, imgs):
        h, w = self.img_shape
        img = jnp.stack(imgs, 0)                          # (2, H, W)
        img_apo = apodize(img, self.apofield, self.apomask_norm)
        # TODO(synk): FFTs have no Pallas primitive on TPU; done with jnp.fft.
        spec = jnp.fft.fft2(img_apo, axes=(1, 2))         # fftshift folded into tap_idx
        spec_flat = spec.reshape(img.shape[0], h * w)
        # TODO(synk): arbitrary VMEM gather has no Pallas TPU primitive; the 16-tap
        #             gather runs in XLA, the fused |.|*HPF + weighted sum in Pallas.
        g = jnp.take(spec_flat, self.tap_idx, axis=1)     # (2, 16, n_pad) complex64
        lp_flat = lp_resample(jnp.real(g), jnp.imag(g), self.tap_w)
        return lp_flat[:, :self.n_out].reshape(img.shape[0], h, w)

    def pcorr_rot_batch_1d(self, lp):
        f = jnp.fft.rfft(lp, axis=1)                      # (2, H//2+1, W) complex64
        c = f[0] * jnp.conj(f[1])
        a_re, a_im = xps_normalize(jnp.real(c), jnp.imag(c))
        a = jax.lax.complex(a_re, a_im)
        b = jnp.fft.irfft(a, axis=0)                      # (H, W) float32
        bsum = jnp.sum(b, axis=1)                         # plain JAX; cheaper than a launch
        idx = jnp.argmax(bsum)
        return idx.astype(jnp.float32) * 180.0 / b.shape[0]

    def __call__(self, prev_im, curr_im):
        lp = self.logPolarNBatch([prev_im, curr_im])
        return self.pcorr_rot_batch_1d(lp)


# ----------------------------------------------------------------------------
if __name__ == "__main__":
    # TODO(synk): the original script builds filterG at [400, 400] with sigma=22, which
    # is shape-inconsistent with img_shape; here it is built at img_shape with a
    # proportionally scaled sigma (same deviation as the previous version).
    sigma = 22.0 * min(H, W) / 400.0
    filterG_np = getGaussianHpf2d((H, W), sigma)

    module = MyModuleJax(filterG_np, img_shape=(H, W))
    forward = jax.jit(module.__call__)

    key = jax.random.PRNGKey(0)
    k1, k2 = jax.random.split(key)
    prev_im = jax.random.normal(k1, (H, W), dtype=jnp.float32)
    curr_im = jax.random.normal(k2, (H, W), dtype=jnp.float32)

    angle = forward(prev_im, curr_im)
    jax.block_until_ready(angle)
    print("KERNEL_OK")
</pallas_src>

<mosaic_0001>
module attributes {stable_mosaic.version = 11 : i64} {
  func.func @apodize_kernel(%arg0: i32, %arg1: memref<2x24x32xf32, #tpu.memory_space<vmem>>, %arg2: memref<24x32xf32, #tpu.memory_space<vmem>>, %arg3: memref<24x32xf32, #tpu.memory_space<vmem>>, %arg4: memref<2x24x32xf32, #tpu.memory_space<vmem>>) attributes {dimension_semantics = [#tpu.dimension_semantics<arbitrary>], iteration_bounds = array<i64: 1>, scalar_prefetch = 0 : i64, scratch_operands = 0 : i64, tpu.core_type = #tpu.core_type<tc>, window_params = [{pipeline_mode = #tpu.pipeline_mode<synchronous>, transform_indices = @transform_0, window_bounds = array<i64: 2, 24, 32>}, {pipeline_mode = #tpu.pipeline_mode<synchronous>, transform_indices = @transform_1, window_bounds = array<i64: 24, 32>}, {pipeline_mode = #tpu.pipeline_mode<synchronous>, transform_indices = @transform_2, window_bounds = array<i64: 24, 32>}, {pipeline_mode = #tpu.pipeline_mode<synchronous>, transform_indices = @transform_3, window_bounds = array<i64: 2, 24, 32>}]} {
    %c0 = arith.constant 0 : index
    %c0_0 = arith.constant 0 : index
    %c0_1 = arith.constant 0 : index
    %0 = vector.load %arg1[%c0, %c0_0, %c0_1] : memref<2x24x32xf32, #tpu.memory_space<vmem>>, vector<2x24x32xf32>
    %c0_2 = arith.constant 0 : index
    %c0_3 = arith.constant 0 : index
    %1 = vector.load %arg2[%c0_2, %c0_3] : memref<24x32xf32, #tpu.memory_space<vmem>>, vector<24x32xf32>
    %c0_4 = arith.constant 0 : index
    %c0_5 = arith.constant 0 : index
    %2 = vector.load %arg3[%c0_4, %c0_5] : memref<24x32xf32, #tpu.memory_space<vmem>>, vector<24x32xf32>
    %3 = vector.shape_cast %2 : vector<24x32xf32> to vector<1x24x32xf32>
    %4 = vector.broadcast %3 : vector<1x24x32xf32> to vector<2x24x32xf32>
    %5 = arith.mulf %0, %4 : vector<2x24x32xf32>
    %cst = arith.constant dense<0.000000e+00> : vector<2x24xf32>
    %6 = vector.multi_reduction <add>, %5, %cst [2] : vector<2x24x32xf32> to vector<2x24xf32>
    %7 = vector.shape_cast %6 : vector<2x24xf32> to vector<2x24x1xf32>
    %cst_6 = arith.constant dense<0.000000e+00> : vector<2x1xf32>
    %8 = vector.multi_reduction <add>, %7, %cst_6 [1] : vector<2x24x1xf32> to vector<2x1xf32>
    %9 = vector.shape_cast %8 : vector<2x1xf32> to vector<2x1x1xf32>
    %10 = vector.shape_cast %1 : vector<24x32xf32> to vector<1x24x32xf32>
    %11 = vector.broadcast %10 : vector<1x24x32xf32> to vector<2x24x32xf32>
    %12 = arith.mulf %0, %11 : vector<2x24x32xf32>
    %cst_7 = arith.constant 1.000000e+00 : f32
    %13 = vector.broadcast %cst_7 : f32 to vector<24x32xf32>
    %14 = arith.subf %13, %1 : vector<24x32xf32>
    %15 = vector.shape_cast %14 : vector<24x32xf32> to vector<1x24x32xf32>
    %16 = vector.broadcast %9 : vector<2x1x1xf32> to vector<2x24x32xf32>
    %17 = vector.broadcast %15 : vector<1x24x32xf32> to vector<2x24x32xf32>
    %18 = arith.mulf %16, %17 : vector<2x24x32xf32>
    %19 = arith.addf %12, %18 : vector<2x24x32xf32>
    %c0_8 = arith.constant 0 : index
    %c0_9 = arith.constant 0 : index
    %c0_10 = arith.constant 0 : index
    %20 = vector.load %arg4[%c0_8, %c0_9, %c0_10] : memref<2x24x32xf32, #tpu.memory_space<vmem>>, vector<2x24x32xf32>
    tpu.vector_store %arg4[%c0_8, %c0_9, %c0_10], %19 {strides = array<i32>} : memref<2x24x32xf32, #tpu.memory_space<vmem>>, vector<2x24x32xf32>,
    return
  }
  func.func @transform_0(%arg0: i32) -> (i32, i32, i32) {
    %c0_i32 = arith.constant 0 : i32
    %c0_i32_0 = arith.constant 0 : i32
    %c0_i32_1 = arith.constant 0 : i32
    %c0_i32_2 = arith.constant 0 : i32
    return %c0_i32, %c0_i32_0, %c0_i32_1 : i32, i32, i32
  }
  func.func @transform_1(%arg0: i32) -> (i32, i32) {
    %c0_i32 = arith.constant 0 : i32
    %c0_i32_0 = arith.constant 0 : i32
    %c0_i32_1 = arith.constant 0 : i32
    return %c0_i32, %c0_i32_0 : i32, i32
  }
  func.func @transform_2(%arg0: i32) -> (i32, i32) {
    %c0_i32 = arith.constant 0 : i32
    %c0_i32_0 = arith.constant 0 : i32
    %c0_i32_1 = arith.constant 0 : i32
    return %c0_i32, %c0_i32_0 : i32, i32
  }
  func.func @transform_3(%arg0: i32) -> (i32, i32, i32) {
    %c0_i32 = arith.constant 0 : i32
    %c0_i32_0 = arith.constant 0 : i32
    %c0_i32_1 = arith.constant 0 : i32
    %c0_i32_2 = arith.constant 0 : i32
    return %c0_i32, %c0_i32_0, %c0_i32_1 : i32, i32, i32
  }
}

module attributes {stable_mosaic.version = 11 : i64} {
  func.func @lp_resample_kernel(%arg0: i32, %arg1: memref<2x16x1024xf32, #tpu.memory_space<vmem>>, %arg2: memref<2x16x1024xf32, #tpu.memory_space<vmem>>, %arg3: memref<16x1024xf32, #tpu.memory_space<vmem>>, %arg4: memref<2x1024xf32, #tpu.memory_space<vmem>>) attributes {dimension_semantics = [#tpu.dimension_semantics<parallel>], iteration_bounds = array<i64: 1>, scalar_prefetch = 0 : i64, scratch_operands = 0 : i64, tpu.core_type = #tpu.core_type<tc>, window_params = [{transform_indices = @transform_0, window_bounds = array<i64: 2, 16, 1024>}, {transform_indices = @transform_1, window_bounds = array<i64: 2, 16, 1024>}, {transform_indices = @transform_2, window_bounds = array<i64: 16, 1024>}, {transform_indices = @transform_3, window_bounds = array<i64: 2, 1024>}]} {
    %c0 = arith.constant 0 : index
    %c0_0 = arith.constant 0 : index
    %c0_1 = arith.constant 0 : index
    %0 = vector.load %arg1[%c0, %c0_0, %c0_1] : memref<2x16x1024xf32, #tpu.memory_space<vmem>>, vector<2x16x1024xf32>
    %c0_2 = arith.constant 0 : index
    %c0_3 = arith.constant 0 : index
    %c0_4 = arith.constant 0 : index
    %1 = vector.load %arg2[%c0_2, %c0_3, %c0_4] : memref<2x16x1024xf32, #tpu.memory_space<vmem>>, vector<2x16x1024xf32>
    %2 = arith.mulf %0, %0 : vector<2x16x1024xf32>
    %3 = arith.mulf %1, %1 : vector<2x16x1024xf32>
    %4 = arith.addf %2, %3 : vector<2x16x1024xf32>
    %5 = math.sqrt %4 : vector<2x16x1024xf32>
    %c0_5 = arith.constant 0 : index
    %c0_6 = arith.constant 0 : index
    %6 = vector.load %arg3[%c0_5, %c0_6] : memref<16x1024xf32, #tpu.memory_space<vmem>>, vector<16x1024xf32>
    %7 = vector.shape_cast %6 : vector<16x1024xf32> to vector<1x16x1024xf32>
    %8 = vector.broadcast %7 : vector<1x16x1024xf32> to vector<2x16x1024xf32>
    %9 = arith.mulf %5, %8 : vector<2x16x1024xf32>
    %cst = arith.constant dense<0.000000e+00> : vector<2x1024xf32>
    %10 = vector.multi_reduction <add>, %9, %cst [1] : vector<2x16x1024xf32> to vector<2x1024xf32>
    %c0_7 = arith.constant 0 : index
    %c0_8 = arith.constant 0 : index
    %11 = vector.load %arg4[%c0_7, %c0_8] : memref<2x1024xf32, #tpu.memory_space<vmem>>, vector<2x1024xf32>
    tpu.vector_store %arg4[%c0_7, %c0_8], %10 {strides = array<i32>} : memref<2x1024xf32, #tpu.memory_space<vmem>>, vector<2x1024xf32>,
    return
  }
  func.func @transform_0(%arg0: i32) -> (i32, i32, i32) {
    %c0_i32 = arith.constant 0 : i32
    %c0_i32_0 = arith.constant 0 : i32
    %c0_i32_1 = arith.constant 0 : i32
    return %c0_i32, %c0_i32_0, %arg0 : i32, i32, i32
  }
  func.func @transform_1(%arg0: i32) -> (i32, i32, i32) {
    %c0_i32 = arith.constant 0 : i32
    %c0_i32_0 = arith.constant 0 : i32
    %c0_i32_1 = arith.constant 0 : i32
    return %c0_i32, %c0_i32_0, %arg0 : i32, i32, i32
  }
  func.func @transform_2(%arg0: i32) -> (i32, i32) {
    %c0_i32 = arith.constant 0 : i32
    %c0_i32_0 = arith.constant 0 : i32
    return %c0_i32, %arg0 : i32, i32
  }
  func.func @transform_3(%arg0: i32) -> (i32, i32) {
    %c0_i32 = arith.constant 0 : i32
    %c0_i32_0 = arith.constant 0 : i32
    return %c0_i32, %arg0 : i32, i32
  }
}

module attributes {stable_mosaic.version = 11 : i64} {
  func.func @xps_normalize_kernel(%arg0: i32, %arg1: memref<13x32xf32, #tpu.memory_space<vmem>>, %arg2: memref<13x32xf32, #tpu.memory_space<vmem>>, %arg3: memref<13x32xf32, #tpu.memory_space<vmem>>, %arg4: memref<13x32xf32, #tpu.memory_space<vmem>>) attributes {dimension_semantics = [#tpu.dimension_semantics<arbitrary>], iteration_bounds = array<i64: 1>, scalar_prefetch = 0 : i64, scratch_operands = 0 : i64, tpu.core_type = #tpu.core_type<tc>, window_params = [{pipeline_mode = #tpu.pipeline_mode<synchronous>, transform_indices = @transform_0, window_bounds = array<i64: 13, 32>}, {pipeline_mode = #tpu.pipeline_mode<synchronous>, transform_indices = @transform_1, window_bounds = array<i64: 13, 32>}, {pipeline_mode = #tpu.pipeline_mode<synchronous>, transform_indices = @transform_2, window_bounds = array<i64: 13, 32>}, {pipeline_mode = #tpu.pipeline_mode<synchronous>, transform_indices = @transform_3, window_bounds = array<i64: 13, 32>}]} {
    %c0 = arith.constant 0 : index
    %c0_0 = arith.constant 0 : index
    %0 = vector.load %arg1[%c0, %c0_0] : memref<13x32xf32, #tpu.memory_space<vmem>>, vector<13x32xf32>
    %c0_1 = arith.constant 0 : index
    %c0_2 = arith.constant 0 : index
    %1 = vector.load %arg2[%c0_1, %c0_2] : memref<13x32xf32, #tpu.memory_space<vmem>>, vector<13x32xf32>
    %2 = arith.mulf %0, %0 : vector<13x32xf32>
    %3 = arith.mulf %1, %1 : vector<13x32xf32>
    %4 = arith.addf %2, %3 : vector<13x32xf32>
    %cst = arith.constant dense<0.000000e+00> : vector<13xf32>
    %5 = vector.multi_reduction <add>, %4, %cst [1] : vector<13x32xf32> to vector<13xf32>
    %6 = vector.shape_cast %5 : vector<13xf32> to vector<13x1xf32>
    %7 = math.sqrt %6 : vector<13x1xf32>
    %cst_3 = arith.constant 9.99999996E-13 : f32
    %8 = vector.broadcast %cst_3 : f32 to vector<13x1xf32>
    %9 = arith.maximumf %7, %8 : vector<13x1xf32>
    %cst_4 = arith.constant 1.000000e+00 : f32
    %10 = vector.broadcast %cst_4 : f32 to vector<13x1xf32>
    %11 = arith.divf %10, %9 : vector<13x1xf32>
    %12 = vector.broadcast %11 : vector<13x1xf32> to vector<13x32xf32>
    %13 = arith.mulf %0, %12 : vector<13x32xf32>
    %c0_5 = arith.constant 0 : index
    %c0_6 = arith.constant 0 : index
    %14 = vector.load %arg3[%c0_5, %c0_6] : memref<13x32xf32, #tpu.memory_space<vmem>>, vector<13x32xf32>
    tpu.vector_store %arg3[%c0_5, %c0_6], %13 {strides = array<i32>} : memref<13x32xf32, #tpu.memory_space<vmem>>, vector<13x32xf32>,
    %15 = vector.broadcast %11 : vector<13x1xf32> to vector<13x32xf32>
    %16 = arith.mulf %1, %15 : vector<13x32xf32>
    %c0_7 = arith.constant 0 : index
    %c0_8 = arith.constant 0 : index
    %17 = vector.load %arg4[%c0_7, %c0_8] : memref<13x32xf32, #tpu.memory_space<vmem>>, vector<13x32xf32>
    tpu.vector_store %arg4[%c0_7, %c0_8], %16 {strides = array<i32>} : memref<13x32xf32, #tpu.memory_space<vmem>>, vector<13x32xf32>,
    return
  }
  func.func @transform_0(%arg0: i32) -> (i32, i32) {
    %c0_i32 = arith.constant 0 : i32
    %c0_i32_0 = arith.constant 0 : i32
    %c0_i32_1 = arith.constant 0 : i32
    return %c0_i32, %c0_i32_0 : i32, i32
  }
  func.func @transform_1(%arg0: i32) -> (i32, i32) {
    %c0_i32 = arith.constant 0 : i32
    %c0_i32_0 = arith.constant 0 : i32
    %c0_i32_1 = arith.constant 0 : i32
    return %c0_i32, %c0_i32_0 : i32, i32
  }
  func.func @transform_2(%arg0: i32) -> (i32, i32) {
    %c0_i32 = arith.constant 0 : i32
    %c0_i32_0 = arith.constant 0 : i32
    %c0_i32_1 = arith.constant 0 : i32
    return %c0_i32, %c0_i32_0 : i32, i32
  }
  func.func @transform_3(%arg0: i32) -> (i32, i32) {
    %c0_i32 = arith.constant 0 : i32
    %c0_i32_0 = arith.constant 0 : i32
    %c0_i32_1 = arith.constant 0 : i32
    return %c0_i32, %c0_i32_0 : i32, i32
  }
}

</mosaic_0001>

<bundles_post_ra>
// kernel: a_call__.3
= control target key start
LH: loop header
LB: loop body
LE: loop exit
PB: predicated region body
PF: predicated region fallthrough
CT: control target
= control target key end

     0   :  { %8 = vsyncpa [#allocation3], 0  ;;  %s254_s0 = inlined_call_operand.vmem [shape: f32[2,24,32], index: 0, kind: input, shape index: {}]   ;;  %s255_s1 = inlined_call_operand.hbm [shape: f32[24,32], index: 1, kind: input, shape index: {}]   ;;  %s256_s2 = inlined_call_operand.hbm [shape: f32[24,32], index: 2, kind: input, shape index: {}]   ;;  %s257_s3 = inlined_call_operand.vmem [shape: f32[2,24,32], index: 3, kind: output, shape index: {}]  }
   0x1   :  { %9 = vsyncpa [#allocation5], 0  ;;  %s176_s12 = smov [#allocation2]  }
   0x2   :  { %s17_s13 = sshll.u32 %s176_s12, 4  ;;  %s18_s13 = int_to_ptr.vmem [resolvable:$true] %s17_s13 }
   0x3   :  { %s140_s14 = scalar_lea.vmem %s18_s13, 384  ;;  %p145_p1 = scmp.lt.s32.totalorder %s18_s13, %s18_s13 }
   0x4   :  { %p141_p0 = scmp.ne.s32.totalorder %s18_s13, %s140_s14  ;;  %p146_p2 = scmp.lt.s32.totalorder %s140_s14, %s140_s14 }
   0x6   :  { %p147_p3 = por %p146_p2, %p145_p1 }
   0x8   :  { %p148_p4 = pnand %p147_p3, %p141_p0 }
   0xa   :  { %151 = shalt.err (!%p148_p4)
}
   0xb   :  { %s177_s15 = smov 128   ;;  %s178_s16 = smov 8  }
   0xc   :  { %23 = dma.hbm_to_vmem [thread:$0]  %s255_s1, 384, %s18_s13, [#allocation3], %s177_s15, %s177_s15, %s178_s16  }
   0xd   :  { %s179_s19 = smov [#allocation4]  }
   0xe   :  { %s29_s20 = sshll.u32 %s179_s19, 4  ;;  %s30_s20 = int_to_ptr.vmem [resolvable:$true] %s29_s20 }
   0xf   :  { %s160_s21 = scalar_lea.vmem %s30_s20, 384  ;;  %p165_p6 = scmp.lt.s32.totalorder %s30_s20, %s30_s20 }
  0x10   :  { %p161_p5 = scmp.ne.s32.totalorder %s30_s20, %s160_s21  ;;  %p166_p7 = scmp.lt.s32.totalorder %s160_s21, %s160_s21 }
  0x12   :  { %p167_p8 = por %p166_p7, %p165_p6 }
  0x14   :  { %p168_p9 = pnand %p167_p8, %p161_p5 }
  0x16   :  { %171 = shalt.err (!%p168_p9)
}
  0x17   :  { %35 = dma.hbm_to_vmem [thread:$0]  %s256_s2, 384, %s30_s20, [#allocation5], %s177_s15, %s177_s15, %s178_s16  }
  0x18   :  { %172 = dma.done.wait [#allocation3], 384  }
  0x19   :  { %173 = vsyncadd [#allocation3], 4294966912 }
  0x1a   :  { %174 = dma.done.wait [#allocation5], 384  }
  0x1b   :  { %175 = vsyncadd [#allocation5], 4294966912  ;;  %v45_v0 = vld [vmem:[%s254_s0 + $0x18] sm:$0xff]  ;;  %vm60_vm0 = vcmask 261120   ;;  %v42_v3 = vld [vmem:[%s254_s0] sm:$0xff] }
  0x1c   :  { %v51_v1 = vld [vmem:[#allocation4] sm:$0xff]  ;;  %v46_v4 = vld [vmem:[%s254_s0 + $0x20] sm:$0xff]  ;;  %v43_v7 = vld [vmem:[%s254_s0 + $0x8] sm:$0xff] }
  0x1d   :  { %v57_v2 = vmul.f32 %v51_v1, %v45_v0  ;;  %v54_v5 = vmul.f32 %v51_v1, %v42_v3  ;;  %v52_v6 = vld [vmem:[#allocation4 + $0x8] sm:$0xff]  ;;  %v47_v8 = vld [vmem:[%s254_s0 + $0x28] sm:$0xff]  ;;  %v44_v13 = vld [vmem:[%s254_s0 + $0x10] sm:$0xff] }
  0x1e   :  { %v58_v10 = vmul.f32 %v52_v6, %v46_v4  ;;  %v55_v11 = vmul.f32 %v52_v6, %v43_v7  ;;  %v53_v12 = vld [vmem:[#allocation4 + $0x10] sm:$0xff]  ;;  %v48_v36 = vld [vmem:[#allocation2] sm:$0xff]  ;;  %v50_v38 = vld [vmem:[#allocation2 + $0x10] sm:$0xff] }
  0x1f   :  { %v70_v9 = vsel %vm60_vm0, %v57_v2, 0.0  ;;  %v61_v14 = vsel %vm60_vm0, %v54_v5, 0.0  ;;  %v59_v16 = vmul.f32 %v53_v12, %v47_v8  ;;  %v56_v18 = vmul.f32 %v53_v12, %v44_v13  ;;  %v49_v37 = vld [vmem:[#allocation2 + $0x8] sm:$0xff] }
  0x20   :  { %71 = vadd.xlane.f32.xlu1 %v70_v9  ;;  %62 = vadd.xlane.f32.xlu0 %v61_v14  ;;  %v73_v15 = vsel %vm60_vm0, %v58_v10, 0.0  ;;  %v64_v17 = vsel %vm60_vm0, %v55_v11, 0.0  ;;  %v101_v42 = vsub.f32 1.0, %v48_v36  ;;  %v102_v43 = vsub.f32 1.0, %v49_v37 }
  0x21   :  { %v76_v19 = vsel %vm60_vm0, %v59_v16, 0.0  ;;  %v67_v20 = vsel %vm60_vm0, %v56_v18, 0.0  ;;  %v103_v44 = vsub.f32 1.0, %v50_v38  ;;  %v98_v47 = vmul.f32 %v48_v36, %v45_v0 }
  0x22   :  { %v99_v48 = vmul.f32 %v49_v37, %v46_v4  ;;  %v100_v49 = vmul.f32 %v50_v38, %v47_v8  ;;  %v95_v51 = vmul.f32 %v48_v36, %v42_v3  ;;  %v96_v52 = vmul.f32 %v49_v37, %v43_v7 }
  0x23   :  { %v97_v53 = vmul.f32 %v50_v38, %v44_v13 }
  0x24   :  { %74 = vadd.xlane.f32.xlu1 %v73_v15  ;;  %65 = vadd.xlane.f32.xlu0 %v64_v17 }
  0x28   :  { %77 = vadd.xlane.f32.xlu1 %v76_v19  ;;  %68 = vadd.xlane.f32.xlu0 %v67_v20 }
  0xa9   :  { %v72_v21 = vpop.xlane.xlu1 %71  ;;  %v63_v22 = vpop.xlane.xlu0 %62 }
  0xad   :  { %v75_v23 = vpop.xlane.xlu1 %74  ;;  %v66_v24 = vpop.xlane.xlu0 %65 }
  0xae   :  { %v87_v25 = vadd.f32 %v75_v23, %v72_v21  ;;  %v79_v26 = vadd.f32 %v66_v24, %v63_v22 }
  0xb1   :  { %v78_v27 = vpop.xlane.xlu1 %77  ;;  %v69_v29 = vpop.xlane.xlu0 %68 }
  0xb2   :  { %v88_v28 = vadd.f32 %v87_v25, %v78_v27  ;;  %v80_v30 = vadd.f32 %v79_v26, %v69_v29 }
  0xb4   :  { %v89_v31 = vrot.slane %v88_v28, 4  ;;  %v81_v32 = vrot.slane %v80_v30, 4 }
  0xb6   :  { %v90_v33 = vadd.f32 %v89_v31, %v88_v28  ;;  %v82_v34 = vadd.f32 %v81_v32, %v80_v30 }
  0xb8   :  { %v91_v35 = vrot.slane %v90_v33, 2  ;;  %v83_v39 = vrot.slane %v82_v34, 2 }
  0xba   :  { %v92_v40 = vadd.f32 %v91_v35, %v90_v33  ;;  %v84_v41 = vadd.f32 %v83_v39, %v82_v34 }
  0xbc   :  { %v93_v45 = vrot.slane %v92_v40, 1  ;;  %v85_v46 = vrot.slane %v84_v41, 1 }
  0xbe   :  { %v94_v50 = vadd.f32 %v93_v45, %v92_v40  ;;  %v86_v54 = vadd.f32 %v85_v46, %v84_v41 }
  0xc0   :  { %v107_v55 = vmul.f32 %v101_v42, %v94_v50  ;;  %v108_v56 = vmul.f32 %v102_v43, %v94_v50  ;;  %v109_v57 = vmul.f32 %v103_v44, %v94_v50  ;;  %v104_v58 = vmul.f32 %v101_v42, %v86_v54 }
  0xc1   :  { %v105_v59 = vmul.f32 %v102_v43, %v86_v54  ;;  %v106_v60 = vmul.f32 %v103_v44, %v86_v54 }
  0xc2   :  { %v113_v61 = vadd.f32 %v107_v55, %v98_v47  ;;  %v114_v62 = vadd.f32 %v108_v56, %v99_v48  ;;  %v115_v63 = vadd.f32 %v109_v57, %v100_v49  ;;  %v110_v1 = vadd.f32 %v104_v58, %v95_v51 }
  0xc3   :  { %v111_v2 = vadd.f32 %v105_v59, %v96_v52  ;;  %v112_v5 = vadd.f32 %v106_v60, %v97_v53 }
  0xc4   :  { %119 = vst.msk [vmem:[%s257_s3 + $0x18] sm:$0xff] %vm60_vm0, %v113_v61  ;;  %120 = vst.msk [vmem:[%s257_s3 + $0x20] sm:$0xff] %vm60_vm0, %v114_v62 }
  0xc5   :  { %121 = vst.msk [vmem:[%s257_s3 + $0x28] sm:$0xff] %vm60_vm0, %v115_v63  ;;  %116 = vst.msk [vmem:[%s257_s3] sm:$0xff] %vm60_vm0, %v110_v1 }
  0xc6   :  { %117 = vst.msk [vmem:[%s257_s3 + $0x8] sm:$0xff] %vm60_vm0, %v111_v2  ;;  %118 = vst.msk [vmem:[%s257_s3 + $0x10] sm:$0xff] %vm60_vm0, %v112_v5 }
  0xc7   :  { %126 = vsyncpa [#allocation3], 1 }
  0xc8   :  { %127 = vsyncpa [#allocation5], 1 }

// kernel: reverse.0
= control target key start
LH: loop header
LB: loop body
LE: loop exit
PB: predicated region body
PF: predicated region fallthrough
CT: control target
= control target key end

     0   :  { %v49_v2 = vlaneseq  ;;  %v55_v3 = vld [vmem:[#allocation0 + $0x7] ss:$-1 sm:$0xff]  ;;  %s136_s0 = inlined_call_operand.vmem [shape: f32[32,11], index: 0, kind: input, shape index: {}]   ;;  %s137_s1 = inlined_call_operand.vmem [shape: f32[32,11], index: 1, kind: output, shape index: {}]  }
   0x1   :  { %v33_v0 = vld [vmem:[%s136_s0] sm:$0xff]  ;;  %v35_v1 = vld [vmem:[%s136_s0 + $0x8] sm:$0xff]  ;;  %v56_v4 = vrot.slane %v55_v3, 5 }
   0x2   :  { %34 = vst [vmem:[#allocation0 + $0x8] sm:$0xff] %v33_v0  ;;  %36 = vst [vmem:[#allocation0 + $0x10] sm:$0xff] %v35_v1  ;;  %v50_v5 = vshrl.u32 %v49_v2, 7 }
   0x3   :  { %57 = vst [vmem:[#allocation1 + $0x8] sm:$0xff] %v56_v4 }
   0x4   :  { %vm51_vm0 = vcmp.lt.s32.totalorder %v50_v5, 3 }
   0x9   :  { %v42_v6 = vld [vmem:[#allocation0 + $0xf] ss:$-1 sm:$0xff]  ;;  %v47_v7 = vld [vmem:[#allocation0 + $0x17] ss:$-1 sm:$0xff] }
   0xa   :  { %v60_v8 = vld [vmem:[#allocation0 + $0xf] ss:$-1 sm:$0xff]  ;;  %v43_v9 = vrot.slane %v42_v6, 5  ;;  %v48_v10 = vrot.slane %v47_v7, 5 }
   0xb   :  { %v61_v11 = vrot.slane %v60_v8, 5 }
   0xc   :  { %44 = vst [vmem:[#allocation1] sm:$0xff] %v43_v9 }
   0xd   :  { %65 = vst.msk [vmem:[#allocation1 + $0x8] sm:$0xff] %vm51_vm0, %v61_v11  ;;  %52 = vst.msk [vmem:[#allocation1] sm:$0xff] %vm51_vm0, %v48_v10 }
  0x14   :  { %v98_v12 = vld [vmem:[#allocation1 + $0x8] sm:$0xff]  ;;  %v96_v13 = vld [vmem:[#allocation1] sm:$0xff] }
  0x15   :  { %99 = vst [vmem:[%s137_s1 + $0x8] sm:$0xff] %v98_v12  ;;  %97 = vst [vmem:[%s137_s1] sm:$0xff] %v96_v13 }

// kernel: a_call__.4
= control target key start
LH: loop header
LB: loop body
LE: loop exit
PB: predicated region body
PF: predicated region fallthrough
CT: control target
= control target key end

     0   :  { %v735_v4 = vmov 1983009808   ;;  %v579_v6 = vlaneseq  ;;  %s1735_s0 = inlined_call_operand.vmem [shape: f32[2,16,1024], index: 0, kind: input, shape index: {}]   ;;  %s1736_s1 = inlined_call_operand.vmem [shape: f32[2,16,1024], index: 1, kind: input, shape index: {}]   ;;  %s1737_s2 = inlined_call_operand.vmem [shape: f32[16,1024], index: 2, kind: input, shape index: {}]   ;;  %s1738_s3 = inlined_call_operand.vmem [shape: f32[2,1024], index: 3, kind: output, shape index: {}]  }
   0x1   :  { %v14_v0 = vld [vmem:[%s1735_s0] sm:$0xff]  ;;  %v15_v1 = vld [vmem:[%s1735_s0 + $0x8] sm:$0xff]  ;;  %v16_v2 = vld [vmem:[%s1735_s0 + $0x10] sm:$0xff]  ;;  %v577_v5 = vunpack.c.l.s4 %v735_v4 }
   0x2   :  { %v17_v3 = vld [vmem:[%s1735_s0 + $0x18] sm:$0xff]  ;;  %v18_v7 = vld [vmem:[%s1735_s0 + $0x20] sm:$0xff]  ;;  %v19_v8 = vld [vmem:[%s1735_s0 + $0x28] sm:$0xff]  ;;  %v580_v22 = vshrl.u32 %v579_v6, 7  ;;  %v819_v26 = vmul.f32 %v14_v0, %v14_v0  ;;  %v821_v27 = vmul.f32 %v15_v1, %v15_v1  ;;  %v823_v28 = vmul.f32 %v16_v2, %v16_v2 }
   0x3   :  { %v20_v9 = vld [vmem:[%s1735_s0 + $0x30] sm:$0xff]  ;;  %v21_v10 = vld [vmem:[%s1735_s0 + $0x38] sm:$0xff]  ;;  %v22_v11 = vld [vmem:[%s1735_s0 + $0x40] sm:$0xff]  ;;  %v578_v21 = vunpack.c.0.s8 %v577_v5  ;;  %v825_v29 = vmul.f32 %v17_v3, %v17_v3  ;;  %v836_v33 = vmul.f32 %v18_v7, %v18_v7  ;;  %v838_v34 = vmul.f32 %v19_v8, %v19_v8 }
   0x4   :  { %v23_v12 = vld [vmem:[%s1735_s0 + $0x48] sm:$0xff]  ;;  %v24_v13 = vld [vmem:[%s1735_s0 + $0x50] sm:$0xff]  ;;  %v25_v14 = vld [vmem:[%s1735_s0 + $0x58] sm:$0xff]  ;;  %v840_v35 = vmul.f32 %v20_v9, %v20_v9  ;;  %v842_v36 = vmul.f32 %v21_v10, %v21_v10  ;;  %v853_v40 = vmul.f32 %v22_v11, %v22_v11 }
   0x5   :  { %v26_v15 = vld [vmem:[%s1735_s0 + $0x60] sm:$0xff]  ;;  %v27_v16 = vld [vmem:[%s1735_s0 + $0x68] sm:$0xff]  ;;  %v28_v17 = vld [vmem:[%s1735_s0 + $0x70] sm:$0xff]  ;;  %v855_v41 = vmul.f32 %v23_v12, %v23_v12  ;;  %v857_v42 = vmul.f32 %v24_v13, %v24_v13  ;;  %v859_v43 = vmul.f32 %v25_v14, %v25_v14  ;;  %v876_v50 = vsub.s32 %v578_v21, %v580_v22 }
   0x6   :  { %v29_v18 = vld [vmem:[%s1735_s0 + $0x78] sm:$0xff]  ;;  %v30_v19 = vld [vmem:[%s1735_s0 + $0x80] sm:$0xff]  ;;  %v31_v20 = vld [vmem:[%s1735_s0 + $0x88] sm:$0xff]  ;;  %v870_v47 = vmul.f32 %v26_v15, %v26_v15  ;;  %v872_v48 = vmul.f32 %v27_v16, %v27_v16  ;;  %v874_v49 = vmul.f32 %v28_v17, %v28_v17 }
   0x7   :  { %v32_v23 = vld [vmem:[%s1735_s0 + $0x90] sm:$0xff]  ;;  %v33_v24 = vld [vmem:[%s1735_s0 + $0x98] sm:$0xff]  ;;  %v34_v25 = vld [vmem:[%s1735_s0 + $0xa0] sm:$0xff]  ;;  %1742 = vst [vmem:[#allocation2_spill] sm:$0xff] %v876_v50  ;;  %v887_v54 = vmul.f32 %v29_v18, %v29_v18  ;;  %v889_v55 = vmul.f32 %v30_v19, %v30_v19  ;;  %v891_v56 = vmul.f32 %v31_v20, %v31_v20 }
   0x8   :  { %v35_v30 = vld [vmem:[%s1735_s0 + $0xa8] sm:$0xff]  ;;  %v36_v31 = vld [vmem:[%s1735_s0 + $0xb0] sm:$0xff]  ;;  %v37_v32 = vld [vmem:[%s1735_s0 + $0xb8] sm:$0xff]  ;;  %v893_v57 = vmul.f32 %v32_v23, %v32_v23  ;;  %v904_v61 = vmul.f32 %v33_v24, %v33_v24  ;;  %v906_v62 = vmul.f32 %v34_v25, %v34_v25 }
   0x9   :  { %v38_v37 = vld [vmem:[%s1735_s0 + $0xc0] sm:$0xff]  ;;  %v39_v38 = vld [vmem:[%s1735_s0 + $0xc8] sm:$0xff]  ;;  %v40_v39 = vld [vmem:[%s1735_s0 + $0xd0] sm:$0xff]  ;;  %v908_v63 = vmul.f32 %v35_v30, %v35_v30  ;;  %v910_v0 = vmul.f32 %v36_v31, %v36_v31  ;;  %v921_v4 = vmul.f32 %v37_v32, %v37_v32 }
   0xa   :  { %v41_v44 = vld [vmem:[%s1735_s0 + $0xd8] sm:$0xff]  ;;  %v42_v45 = vld [vmem:[%s1735_s0 + $0xe0] sm:$0xff]  ;;  %v43_v51 = vld [vmem:[%s1735_s0 + $0xe8] sm:$0xff]  ;;  %v923_v5 = vmul.f32 %v38_v37, %v38_v37  ;;  %v925_v6 = vmul.f32 %v39_v38, %v39_v38  ;;  %v936_v11 = vmul.f32 %v40_v39, %v40_v39 }
   0xb   :  { %v46_v46 = vld [vmem:[%s1736_s1] sm:$0xff]  ;;  %v44_v52 = vld [vmem:[%s1735_s0 + $0xf0] sm:$0xff]  ;;  %v47_v53 = vld [vmem:[%s1736_s1 + $0x8] sm:$0xff]  ;;  %v938_v12 = vmul.f32 %v41_v44, %v41_v44  ;;  %v940_v13 = vmul.f32 %v42_v45, %v42_v45  ;;  %v951_v18 = vmul.f32 %v43_v51, %v43_v51 }
   0xc   :  { %v45_v58 = vld [vmem:[%s1735_s0 + $0xf8] sm:$0xff]  ;;  %v48_v59 = vld [vmem:[%s1736_s1 + $0x10] sm:$0xff]  ;;  %v50_v1 = vld [vmem:[%s1736_s1 + $0x20] sm:$0xff]  ;;  %v110_v7 = vmul.f32 %v46_v46, %v46_v46  ;;  %v111_v14 = vmul.f32 %v47_v53, %v47_v53  ;;  %v953_v19 = vmul.f32 %v44_v52, %v44_v52 }
   0xd   :  { %v49_v60 = vld [vmem:[%s1736_s1 + $0x18] sm:$0xff]  ;;  %v51_v2 = vld [vmem:[%s1736_s1 + $0x28] sm:$0xff]  ;;  %v52_v3 = vld [vmem:[%s1736_s1 + $0x30] sm:$0xff]  ;;  %1743 = vst [vmem:[#allocation3_spill] sm:$0xff] %v951_v18  ;;  %v955_v20 = vmul.f32 %v45_v58, %v45_v58  ;;  %v112_v21 = vmul.f32 %v48_v59, %v48_v59  ;;  %v114_v30 = vmul.f32 %v50_v1, %v50_v1 }
   0xe   :  { %v53_v8 = vld [vmem:[%s1736_s1 + $0x38] sm:$0xff]  ;;  %v54_v9 = vld [vmem:[%s1736_s1 + $0x40] sm:$0xff]  ;;  %v55_v10 = vld [vmem:[%s1736_s1 + $0x48] sm:$0xff]  ;;  %1744 = vst [vmem:[#allocation4_spill] sm:$0xff] %v953_v19  ;;  %v113_v25 = vmul.f32 %v49_v60, %v49_v60  ;;  %v115_v31 = vmul.f32 %v51_v2, %v51_v2  ;;  %v116_v32 = vmul.f32 %v52_v3, %v52_v3  ;;  %v976_v51 = vadd.f32 %v110_v7, %v819_v26 }
   0xf   :  { %v56_v15 = vld [vmem:[%s1736_s1 + $0x50] sm:$0xff]  ;;  %v57_v16 = vld [vmem:[%s1736_s1 + $0x58] sm:$0xff]  ;;  %v58_v17 = vld [vmem:[%s1736_s1 + $0x60] sm:$0xff]  ;;  %1745 = vst [vmem:[#allocation5_spill] sm:$0xff] %v955_v20  ;;  %v117_v44 = vmul.f32 %v53_v8, %v53_v8  ;;  %v118_v45 = vmul.f32 %v54_v9, %v54_v9  ;;  %v119_v46 = vmul.f32 %v55_v10, %v55_v10  ;;  %v988_v2 = vadd.f32 %v111_v14, %v821_v27 }
  0x10   :  { %v59_v22 = vld [vmem:[%s1736_s1 + $0x68] sm:$0xff]  ;;  %v60_v23 = vld [vmem:[%s1736_s1 + $0x70] sm:$0xff]  ;;  %v61_v24 = vld [vmem:[%s1736_s1 + $0x78] sm:$0xff]  ;;  %1746 = vst [vmem:[#allocation6_spill] sm:$0xff] %v976_v51  ;;  %v120_v59 = vmul.f32 %v56_v15, %v56_v15  ;;  %v121_v60 = vmul.f32 %v57_v16, %v57_v16  ;;  %v122_v1 = vmul.f32 %v58_v17, %v58_v17  ;;  %v997_v10 = vadd.f32 %v112_v21, %v823_v28 }
  0x11   :  { %v62_v37 = vld [vmem:[%s1736_s1 + $0x80] sm:$0xff]  ;;  %v63_v38 = vld [vmem:[%s1736_s1 + $0x88] sm:$0xff]  ;;  %v64_v39 = vld [vmem:[%s1736_s1 + $0x90] sm:$0xff]  ;;  %v123_v7 = vmul.f32 %v59_v22, %v59_v22  ;;  %v124_v8 = vmul.f32 %v60_v23, %v60_v23  ;;  %v125_v9 = vmul.f32 %v61_v24, %v61_v24  ;;  %v1006_v50 = vadd.f32 %v113_v25, %v825_v29 }
  0x12   :  { %v65_v52 = vld [vmem:[%s1736_s1 + $0x98] sm:$0xff]  ;;  %v66_v53 = vld [vmem:[%s1736_s1 + $0xa0] sm:$0xff]  ;;  %v67_v58 = vld [vmem:[%s1736_s1 + $0xa8] sm:$0xff]  ;;  %v126_v14 = vmul.f32 %v62_v37, %v62_v37  ;;  %v127_v16 = vmul.f32 %v63_v38, %v63_v38  ;;  %v128_v17 = vmul.f32 %v64_v39, %v64_v39  ;;  %v1015_v20 = vadd.f32 %v114_v30, %v836_v33 }
  0x13   :  { %v68_v26 = vld [vmem:[%s1736_s1 + $0xb0] sm:$0xff]  ;;  %v69_v3 = vld [vmem:[%s1736_s1 + $0xb8] sm:$0xff]  ;;  %v70_v15 = vld [vmem:[%s1736_s1 + $0xc0] sm:$0xff]  ;;  %v129_v21 = vmul.f32 %v65_v52, %v65_v52  ;;  %v130_v23 = vmul.f32 %v66_v53, %v66_v53  ;;  %v131_v24 = vmul.f32 %v67_v58, %v67_v58  ;;  %v1027_v52 = vadd.f32 %v115_v31, %v838_v34 }
  0x14   :  { %v71_v27 = vld [vmem:[%s1736_s1 + $0xc8] sm:$0xff]  ;;  %v72_v22 = vld [vmem:[%s1736_s1 + $0xd0] sm:$0xff]  ;;  %v73_v28 = vld [vmem:[%s1736_s1 + $0xd8] sm:$0xff]  ;;  %v132_v38 = vmul.f32 %v68_v26, %v68_v26  ;;  %v133_v39 = vmul.f32 %v69_v3, %v69_v3  ;;  %671 = vrsqrt.f32 %v976_v51  ;;  %v134_v30 = vmul.f32 %v70_v15, %v70_v15 }
  0x15   :  { %v74_v37 = vld [vmem:[%s1736_s1 + $0xe0] sm:$0xff]  ;;  %v75_v29 = vld [vmem:[%s1736_s1 + $0xe8] sm:$0xff]  ;;  %v76_v25 = vld [vmem:[%s1736_s1 + $0xf0] sm:$0xff]  ;;  %v135_v53 = vmul.f32 %v71_v27, %v71_v27  ;;  %v1034_v58 = vadd.f32 %v116_v32, %v840_v35  ;;  %673 = vrsqrt.f32 %v988_v2  ;;  %v136_v19 = vmul.f32 %v72_v22, %v72_v22 }
  0x16   :  { %v77_v33 = vld [vmem:[%s1736_s1 + $0xf8] sm:$0xff]  ;;  %v137_v18 = vmul.f32 %v73_v28, %v73_v28  ;;  %v1038_v26 = vadd.f32 %v117_v44, %v842_v36  ;;  %675 = vrsqrt.f32 %v997_v10  ;;  %v138_v34 = vmul.f32 %v74_v37, %v74_v37 }
  0x17   :  { %v139_v31 = vmul.f32 %v75_v29, %v75_v29  ;;  %v140_v3 = vmul.f32 %v76_v25, %v76_v25  ;;  %677 = vrsqrt.f32 %v1006_v50  ;;  %v141_v51 = vmul.f32 %v77_v33, %v77_v33 }
  0x18   :  { %v1043_v15 = vadd.f32 %v118_v45, %v853_v40  ;;  %v1046_v35 = vadd.f32 %v119_v46, %v855_v41  ;;  %679 = vrsqrt.f32 %v1015_v20  ;;  %v1050_v32 = vadd.f32 %v120_v59, %v857_v42 }
  0x19   :  { %v1053_v36 = vadd.f32 %v121_v60, %v859_v43  ;;  %v1056_v44 = vadd.f32 %v122_v1, %v870_v47  ;;  %681 = vrsqrt.f32 %v1027_v52  ;;  %v1060_v27 = vadd.f32 %v123_v7, %v872_v48 }
  0x1a   :  { %v1063_v40 = vadd.f32 %v124_v8, %v874_v49  ;;  %v1066_v41 = vadd.f32 %v125_v9, %v887_v54  ;;  %683 = vrsqrt.f32 %v1034_v58  ;;  %v1070_v42 = vadd.f32 %v126_v14, %v889_v55 }
  0x1b   :  { %v1073_v43 = vadd.f32 %v127_v16, %v891_v56  ;;  %v1076_v47 = vadd.f32 %v128_v17, %v893_v57  ;;  %685 = vrsqrt.f32 %v1038_v26  ;;  %v1080_v48 = vadd.f32 %v129_v21, %v904_v61 }
  0x1c   :  { %v1083_v49 = vadd.f32 %v130_v23, %v906_v62  ;;  %v1086_v54 = vadd.f32 %v131_v24, %v908_v63  ;;  %687 = vrsqrt.f32 %v1043_v15  ;;  %v1090_v55 = vadd.f32 %v132_v38, %v910_v0 }
  0x1d   :  { %v1093_v56 = vadd.f32 %v133_v39, %v921_v4  ;;  %v1096_v57 = vadd.f32 %v134_v30, %v923_v5  ;;  %689 = vrsqrt.f32 %v1046_v35  ;;  %v1100_v61 = vadd.f32 %v135_v53, %v925_v6  ;;  %v1747_v4 = vld [vmem:[#allocation3_spill] sm:$0xff]  ;;  %v1748_v5 = vld [vmem:[#allocation4_spill] sm:$0xff]  ;;  %v1749_v6 = vld [vmem:[#allocation5_spill] sm:$0xff] }
  0x1e   :  { %v1103_v62 = vadd.f32 %v136_v19, %v936_v11  ;;  %v1106_v63 = vadd.f32 %v137_v18, %v938_v12  ;;  %691 = vrsqrt.f32 %v1050_v32  ;;  %v1110_v0 = vadd.f32 %v138_v34, %v940_v13  ;;  %v1750_v11 = vld [vmem:[#allocation6_spill] sm:$0xff] }
  0x1f   :  { %v1113_v45 = vadd.f32 %v139_v31, %v1747_v4  ;;  %v1116_v46 = vadd.f32 %v140_v3, %v1748_v5  ;;  %693 = vrsqrt.f32 %v1053_v36  ;;  %v1120_v59 = vadd.f32 %v141_v51, %v1749_v6 }
  0x20   :  { %vm176_vm0 = vcmp.eq.f32.partialorder %v1750_v11, inf  ;;  %v179_v12 = vand.u32 2147483648, %v1750_v11  ;;  %695 = vrsqrt.f32 %v1056_v44  ;;  %vm178_vm1 = vcmp.eq.f32.partialorder %v1750_v11, 0.0 }
  0x21   :  { %v672_v18 = vpop.eup %671  ;;  %vm183_vm2 = vcmp.eq.f32.partialorder %v988_v2, inf  ;;  %v186_v13 = vand.u32 2147483648, %v988_v2  ;;  %vm190_vm3 = vcmp.eq.f32.partialorder %v997_v10, inf  ;;  %697 = vrsqrt.f32 %v1060_v27 }
  0x22   :  { %v674_v19 = vpop.eup %673  ;;  %vm185_vm4 = vcmp.eq.f32.partialorder %v988_v2, 0.0  ;;  %vm192_vm5 = vcmp.eq.f32.partialorder %v997_v10, 0.0  ;;  %v193_v51 = vand.u32 2147483648, %v997_v10  ;;  %vm197_vm6 = vcmp.eq.f32.partialorder %v1006_v50, inf }
  0x23   :  { %v200_v60 = vand.u32 2147483648, %v1006_v50  ;;  %699 = vrsqrt.f32 %v1063_v40  ;;  %v676_v1 = vpop.eup %675  ;;  %vm199_vm7 = vcmp.eq.f32.partialorder %v1006_v50, 0.0  ;;  %vm204_vm8 = vcmp.eq.f32.partialorder %v1015_v20, inf }
  0x24   :  { %v207_v7 = vand.u32 2147483648, %v1015_v20  ;;  %vm211_vm9 = vcmp.eq.f32.partialorder %v1027_v52, inf  ;;  %701 = vrsqrt.f32 %v1066_v41  ;;  %v678_v8 = vpop.eup %677  ;;  %v214_v9 = vand.u32 2147483648, %v1027_v52 }
  0x25   :  { %v221_v14 = vand.u32 2147483648, %v1034_v58  ;;  %v680_v16 = vpop.eup %679  ;;  %v175_v17 = vmul.f32 %v672_v18, %v1750_v11  ;;  %v228_v22 = vand.u32 2147483648, %v1038_v26  ;;  %703 = vrsqrt.f32 %v1070_v42 }
  0x26   :  { %v682_v28 = vpop.eup %681  ;;  %v182_v21 = vmul.f32 %v674_v19, %v988_v2  ;;  %v189_v23 = vmul.f32 %v676_v1, %v997_v10  ;;  %v235_v24 = vand.u32 2147483648, %v1043_v15  ;;  %v196_v29 = vmul.f32 %v678_v8, %v1006_v50 }
  0x27   :  { %v684_v37 = vpop.eup %683  ;;  %vm220_vm12 = vcmp.eq.f32.partialorder %v1034_v58, 0.0  ;;  %v242_v25 = vand.u32 2147483648, %v1046_v35  ;;  %v249_v38 = vand.u32 2147483648, %v1050_v32  ;;  %v203_v33 = vmul.f32 %v680_v16, %v1015_v20 }
  0x28   :  { %v686_v39 = vpop.eup %685  ;;  %vm234_vm14 = vcmp.eq.f32.partialorder %v1043_v15, 0.0  ;;  %vm241_vm15 = vcmp.eq.f32.partialorder %v1046_v35, 0.0  ;;  %vm253_vm10 = vcmp.eq.f32.partialorder %v1053_v36, inf  ;;  %v256_v30 = vand.u32 2147483648, %v1053_v36 }
  0x29   :  { %v263_v53 = vand.u32 2147483648, %v1056_v44  ;;  %v688_v34 = vpop.eup %687  ;;  %v177_v31 = vsel %vm176_vm0, %v1750_v11, %v175_v17  ;;  %vm267_vm13 = vcmp.eq.f32.partialorder %v1060_v27, inf  ;;  %v270_v3 = vand.u32 2147483648, %v1060_v27 }
  0x2a   :  { %705 = vrsqrt.f32 %v1073_v43  ;;  %v690_v4 = vpop.eup %689  ;;  %v184_v5 = vsel %vm183_vm2, %v988_v2, %v182_v21  ;;  %v191_v6 = vsel %vm190_vm3, %v997_v10, %v189_v23  ;;  %v210_v18 = vmul.f32 %v682_v28, %v1027_v52 }
  0x2b   :  { %vm248_vm0 = vcmp.eq.f32.partialorder %v1050_v32, 0.0  ;;  %vm274_vm11 = vcmp.eq.f32.partialorder %v1063_v40, inf  ;;  %v277_v19 = vand.u32 2147483648, %v1063_v40  ;;  %v692_v1 = vpop.eup %691  ;;  %v198_v8 = vsel %vm197_vm6, %v1006_v50, %v196_v29 }
  0x2c   :  { %v217_v16 = vmul.f32 %v684_v37, %v1034_v58  ;;  %v224_v17 = vmul.f32 %v686_v39, %v1038_v26  ;;  %vm255_vm2 = vcmp.eq.f32.partialorder %v1053_v36, 0.0  ;;  %v694_v21 = vpop.eup %693  ;;  %v1196_v23 = vsel %vm178_vm1, %v179_v12, %v177_v31 }
  0x2d   :  { %v205_v29 = vsel %vm204_vm8, %v1015_v20, %v203_v33  ;;  %v231_v37 = vmul.f32 %v688_v34, %v1043_v15  ;;  %v238_v39 = vmul.f32 %v690_v4, %v1046_v35  ;;  %vm262_vm6 = vcmp.eq.f32.partialorder %v1056_v44, 0.0  ;;  %v696_v28 = vpop.eup %695 }
  0x2e   :  { %vm269_vm3 = vcmp.eq.f32.partialorder %v1060_v27, 0.0  ;;  %v1209_v11 = vsel %vm185_vm4, %v186_v13, %v184_v5  ;;  %v1215_v12 = vsel %vm192_vm5, %v193_v51, %v191_v6  ;;  %vm276_vm1 = vcmp.eq.f32.partialorder %v1063_v40, 0.0  ;;  %v698_v33 = vpop.eup %697 }
  0x2f   :  { %707 = vrsqrt.f32 %v1076_v47  ;;  %v1224_v2 = vsel %vm199_vm7, %v200_v60, %v198_v8  ;;  %v212_v13 = vsel %vm211_vm9, %v1027_v52, %v210_v18  ;;  %v245_v10 = vmul.f32 %v692_v1, %v1050_v32 }
  0x30   :  { %v291_v51 = vand.u32 2147483648, %v1070_v42  ;;  %v700_v34 = vpop.eup %699  ;;  %vm1751_vm5 = vcmp.eq.f32.partialorder %v1015_v20, 0.0  ;;  %vm1752_vm7 = vcmp.eq.f32.partialorder %v1034_v58, inf  ;;  %vm1753_vm9 = vcmp.eq.f32.partialorder %v1038_v26, inf }
  0x31   :  { %v1236_v31 = vsel %vm1751_vm5, %v207_v7, %v205_v29  ;;  %v219_v50 = vsel %vm1752_vm7, %v1034_v58, %v217_v16  ;;  %v226_v60 = vsel %vm1753_vm9, %v1038_v26, %v224_v17  ;;  %v252_v4 = vmul.f32 %v694_v21, %v1053_v36  ;;  %v702_v5 = vpop.eup %701 }
  0x32   :  { %vm1754_vm4 = vcmp.eq.f32.partialorder %v1043_v15, inf  ;;  %vm1755_vm8 = vcmp.eq.f32.partialorder %v1046_v35, inf  ;;  %v259_v7 = vmul.f32 %v696_v28, %v1056_v44  ;;  %v266_v18 = vmul.f32 %v698_v33, %v1060_v27  ;;  %v704_v16 = vpop.eup %703 }
  0x33   :  { %v233_v6 = vsel %vm1754_vm4, %v1043_v15, %v231_v37  ;;  %v240_v20 = vsel %vm1755_vm8, %v1046_v35, %v238_v39  ;;  %vm290_vm5 = vcmp.eq.f32.partialorder %v1070_v42, 0.0  ;;  %vm1756_vm7 = vcmp.eq.f32.partialorder %v1027_v52, 0.0 }
  0x34   :  { %v1258_v1 = vsel %vm1756_vm7, %v214_v9, %v212_v13  ;;  %v273_v8 = vmul.f32 %v700_v34, %v1063_v40  ;;  %vm295_vm4 = vcmp.eq.f32.partialorder %v1073_v43, inf  ;;  %709 = vrsqrt.f32 %v1080_v48 }
  0x35   :  { %v1267_v17 = vsel %vm220_vm12, %v221_v14, %v219_v50  ;;  %vm1757_vm8 = vcmp.eq.f32.partialorder %v1038_v26, 0.0  ;;  %vm1758_vm9 = vcmp.eq.f32.partialorder %v1050_v32, inf  ;;  %v280_v28 = vmul.f32 %v702_v5, %v1066_v41 }
  0x36   :  { %v1273_v52 = vsel %vm1757_vm8, %v228_v22, %v226_v60  ;;  %v247_v9 = vsel %vm1758_vm9, %v1050_v32, %v245_v10  ;;  %v1283_v21 = vsel %vm234_vm14, %v235_v24, %v233_v6  ;;  %v1289_v58 = vsel %vm241_vm15, %v242_v25, %v240_v20 }
  0x37   :  { %v254_v26 = vsel %vm253_vm10, %v1053_v36, %v252_v4  ;;  %vm297_vm12 = vcmp.eq.f32.partialorder %v1073_v43, 0.0  ;;  %v298_v14 = vand.u32 2147483648, %v1073_v43  ;;  %vm1759_vm7 = vcmp.eq.f32.partialorder %v1056_v44, inf  ;;  %v706_v29 = vpop.eup %705 }
  0x38   :  { %v261_v15 = vsel %vm1759_vm7, %v1056_v44, %v259_v7  ;;  %v268_v22 = vsel %vm267_vm13, %v1060_v27, %v266_v18  ;;  %v287_v35 = vmul.f32 %v704_v16, %v1070_v42  ;;  %711 = vrsqrt.f32 %v1083_v49 }
  0x39   :  { %v1308_v24 = vsel %vm248_vm0, %v249_v38, %v247_v9  ;;  %v275_v25 = vsel %vm274_vm11, %v1063_v40, %v273_v8  ;;  %vm302_vm10 = vcmp.eq.f32.partialorder %v1076_v47, inf  ;;  %713 = vrsqrt.f32 %v1086_v54 }
  0x3a   :  { %v1319_v37 = vsel %vm255_vm2, %v256_v30, %v254_v26  ;;  %vm1760_vm13 = vcmp.eq.f32.partialorder %v1066_v41, inf  ;;  %vm304_vm14 = vcmp.eq.f32.partialorder %v1076_v47, 0.0  ;;  %v305_v38 = vand.u32 2147483648, %v1076_v47 }
  0x3b   :  { %v282_v32 = vsel %vm1760_vm13, %v1066_v41, %v280_v28  ;;  %715 = vrsqrt.f32 %v1090_v55  ;;  %v1331_v39 = vsel %vm262_vm6, %v263_v53, %v261_v15  ;;  %v1337_v36 = vsel %vm269_vm3, %v270_v3, %v268_v22  ;;  %v1425_v22 = vld [vmem:[%s1737_s2] sm:$0xff] }
  0x3c   :  { %v294_v30 = vmul.f32 %v706_v29, %v1073_v43  ;;  %vm309_vm11 = vcmp.eq.f32.partialorder %v1080_v48, inf  ;;  %v1345_v33 = vsel %vm276_vm1, %v277_v19, %v275_v25  ;;  %vm1761_vm15 = vcmp.eq.f32.partialorder %v1070_v42, inf  ;;  %v708_v40 = vpop.eup %707 }
  0x3d   :  { %v289_v44 = vsel %vm1761_vm15, %v1070_v42, %v287_v35  ;;  %vm311_vm0 = vcmp.eq.f32.partialorder %v1080_v48, 0.0  ;;  %717 = vrsqrt.f32 %v1093_v56  ;;  %v1762_v27 = vand.u32 2147483648, %v1066_v41  ;;  %v1430_v35 = vld [vmem:[%s1737_s2 + $0x8] sm:$0xff] }
  0x3e   :  { %vm1763_vm2 = vcmp.eq.f32.partialorder %v1066_v41, 0.0  ;;  %v312_v3 = vand.u32 2147483648, %v1080_v48  ;;  %vm316_vm3 = vcmp.eq.f32.partialorder %v1083_v49, inf  ;;  %719 = vrsqrt.f32 %v1096_v57 }
  0x3f   :  { %v1356_v53 = vsel %vm1763_vm2, %v1762_v27, %v282_v32  ;;  %vm318_vm6 = vcmp.eq.f32.partialorder %v1083_v49, 0.0  ;;  %v319_v19 = vand.u32 2147483648, %v1083_v49  ;;  %vm323_vm1 = vcmp.eq.f32.partialorder %v1086_v54, inf  ;;  %v1438_v32 = vld [vmem:[%s1737_s2 + $0x10] sm:$0xff] }
  0x40   :  { %721 = vrsqrt.f32 %v1100_v61  ;;  %v1367_v41 = vsel %vm290_vm5, %v291_v51, %v289_v44  ;;  %v296_v13 = vsel %vm295_vm4, %v1073_v43, %v294_v30  ;;  %v301_v10 = vmul.f32 %v708_v40, %v1076_v47  ;;  %v1462_v40 = vld [vmem:[%s1737_s2 + $0x20] sm:$0xff] }
  0x41   :  { %723 = vrsqrt.f32 %v1103_v62  ;;  %vm325_vm8 = vcmp.eq.f32.partialorder %v1086_v54, 0.0  ;;  %v326_v34 = vand.u32 2147483648, %v1086_v54  ;;  %vm330_vm9 = vcmp.eq.f32.partialorder %v1090_v55, inf  ;;  %v710_v50 = vpop.eup %709 }
  0x42   :  { %725 = vrsqrt.f32 %v1106_v63  ;;  %vm332_vm7 = vcmp.eq.f32.partialorder %v1090_v55, 0.0  ;;  %v333_v42 = vand.u32 2147483648, %v1090_v55  ;;  %vm337_vm5 = vcmp.eq.f32.partialorder %v1093_v56, inf }
  0x43   :  { %v340_v51 = vand.u32 2147483648, %v1093_v56  ;;  %v1384_v60 = vsel %vm297_vm12, %v298_v14, %v296_v13  ;;  %v303_v4 = vsel %vm302_vm10, %v1076_v47, %v301_v10  ;;  %vm339_vm4 = vcmp.eq.f32.partialorder %v1093_v56, 0.0 }
  0x44   :  { %vm344_vm13 = vcmp.eq.f32.partialorder %v1096_v57, inf  ;;  %v347_v5 = vand.u32 2147483648, %v1096_v57  ;;  %727 = vrsqrt.f32 %v1110_v0  ;;  %v308_v6 = vmul.f32 %v710_v50, %v1080_v48 }
  0x45   :  { %vm346_vm15 = vcmp.eq.f32.partialorder %v1096_v57, 0.0  ;;  %v354_v43 = vand.u32 2147483648, %v1100_v61  ;;  %729 = vrsqrt.f32 %v1113_v45  ;;  %vm358_vm10 = vcmp.eq.f32.partialorder %v1103_v62, inf  ;;  %v712_v18 = vpop.eup %711 }
  0x46   :  { %v361_v20 = vand.u32 2147483648, %v1103_v62  ;;  %v368_v7 = vand.u32 2147483648, %v1106_v63  ;;  %731 = vrsqrt.f32 %v1116_v46  ;;  %v1405_v8 = vsel %vm304_vm14, %v305_v38, %v303_v4  ;;  %v714_v28 = vpop.eup %713  ;;  %v1443_v38 = vld [vmem:[%s1737_s2 + $0x18] sm:$0xff] }
  0x47   :  { %v310_v16 = vsel %vm309_vm11, %v1080_v48, %v308_v6  ;;  %vm360_vm2 = vcmp.eq.f32.partialorder %v1103_v62, 0.0  ;;  %vm365_vm12 = vcmp.eq.f32.partialorder %v1106_v63, inf  ;;  %v375_v9 = vand.u32 2147483648, %v1110_v0 }
  0x48   :  { %733 = vrsqrt.f32 %v1120_v59  ;;  %v1416_v26 = vsel %vm311_vm0, %v312_v3, %v310_v16  ;;  %v315_v47 = vmul.f32 %v712_v18, %v1083_v49  ;;  %vm367_vm14 = vcmp.eq.f32.partialorder %v1106_v63, 0.0  ;;  %v716_v48 = vpop.eup %715 }
  0x49   :  { %v382_v14 = vand.u32 2147483648, %v1113_v45  ;;  %v389_v15 = vand.u32 2147483648, %v1116_v46  ;;  %v322_v25 = vmul.f32 %v714_v28, %v1086_v54  ;;  %v1447_v30 = vmul.f32 %v1425_v22, %v1196_v23  ;;  %v1467_v23 = vld [vmem:[%s1737_s2 + $0x28] sm:$0xff] }
  0x4a   :  { %v1451_v44 = vmul.f32 %v1430_v35, %v1209_v11  ;;  %v317_v27 = vsel %vm316_vm3, %v1083_v49, %v315_v47  ;;  %v329_v3 = vmul.f32 %v716_v48, %v1090_v55  ;;  %vm374_vm0 = vcmp.eq.f32.partialorder %v1110_v0, 0.0  ;;  %v718_v10 = vpop.eup %717  ;;  %v407_v48 = vld [vmem:[%s1737_s2 + $0x48] sm:$0xff] }
  0x4b   :  { %v1471_v11 = vmul.f32 %v1438_v32, %v1215_v12  ;;  %v1475_v13 = vmul.f32 %v1443_v38, %v1224_v2  ;;  %v1481_v50 = vsel %vm318_vm6, %v319_v19, %v317_v27  ;;  %v324_v4 = vsel %vm323_vm1, %v1086_v54, %v322_v25  ;;  %v1491_v12 = vld [vmem:[%s1737_s2 + $0x30] sm:$0xff]  ;;  %v720_v19 = vpop.eup %719 }
  0x4c   :  { %vm381_vm3 = vcmp.eq.f32.partialorder %v1113_v45, 0.0  ;;  %vm386_vm11 = vcmp.eq.f32.partialorder %v1116_v46, inf  ;;  %v1495_v2 = vmul.f32 %v1462_v40, %v1236_v31  ;;  %v1499_v49 = vmul.f32 %v1467_v23, %v1258_v1  ;;  %v405_v31 = vld [vmem:[%s1737_s2 + $0x38] sm:$0xff]  ;;  %v406_v1 = vld [vmem:[%s1737_s2 + $0x40] sm:$0xff]  ;;  %v408_v25 = vld [vmem:[%s1737_s2 + $0x50] sm:$0xff] }
  0x4d   :  { %v327_v6 = vsel %vm325_vm8, %v326_v34, %v324_v4  ;;  %v331_v18 = vsel %vm330_vm9, %v1090_v55, %v329_v3  ;;  %v336_v16 = vmul.f32 %v718_v10, %v1093_v56  ;;  %vm388_vm6 = vcmp.eq.f32.partialorder %v1116_v46, 0.0  ;;  %v722_v34 = vpop.eup %721  ;;  %v409_v10 = vld [vmem:[%s1737_s2 + $0x58] sm:$0xff] }
  0x4e   :  { %vm393_vm1 = vcmp.eq.f32.partialorder %v1120_v59, inf  ;;  %v1519_v54 = vmul.f32 %v1491_v12, %v1267_v17  ;;  %v334_v28 = vsel %vm332_vm7, %v333_v42, %v331_v18  ;;  %v343_v47 = vmul.f32 %v720_v19, %v1096_v57  ;;  %v724_v3 = vpop.eup %723 }
  0x4f   :  { %vm395_vm8 = vcmp.eq.f32.partialorder %v1120_v59, 0.0  ;;  %v1534_v17 = vmul.f32 %v405_v31, %v1273_v52  ;;  %v422_v27 = vmul.f32 %v406_v1, %v1283_v21  ;;  %v338_v55 = vsel %vm337_vm5, %v1093_v56, %v336_v16  ;;  %v726_v18 = vpop.eup %725 }
  0x50   :  { %v350_v42 = vmul.f32 %v722_v34, %v1100_v61  ;;  %v423_v4 = vmul.f32 %v407_v48, %v1289_v58  ;;  %v424_v19 = vmul.f32 %v408_v25, %v1308_v24  ;;  %v341_v52 = vsel %vm339_vm4, %v340_v51, %v338_v55  ;;  %v410_v34 = vld [vmem:[%s1737_s2 + $0x60] sm:$0xff] }
  0x51   :  { %v345_v21 = vsel %vm344_vm13, %v1096_v57, %v343_v47  ;;  %v357_v16 = vmul.f32 %v724_v3, %v1103_v62  ;;  %v425_v58 = vmul.f32 %v409_v10, %v1319_v37  ;;  %vm1764_vm9 = vcmp.eq.f32.partialorder %v1100_v61, inf  ;;  %v411_v47 = vld [vmem:[%s1737_s2 + $0x68] sm:$0xff]  ;;  %v412_v3 = vld [vmem:[%s1737_s2 + $0x70] sm:$0xff]  ;;  %v728_v55 = vpop.eup %727 }
  0x52   :  { %v348_v24 = vsel %vm346_vm15, %v347_v5, %v345_v21  ;;  %v352_v56 = vsel %vm1764_vm9, %v1100_v61, %v350_v42  ;;  %v364_v51 = vmul.f32 %v726_v18, %v1106_v63  ;;  %v426_v37 = vmul.f32 %v410_v34, %v1331_v39  ;;  %v413_v42 = vld [vmem:[%s1737_s2 + $0x78] sm:$0xff]  ;;  %v730_v29 = vpop.eup %729 }
  0x53   :  { %vm1765_vm7 = vcmp.eq.f32.partialorder %v1100_v61, 0.0  ;;  %v359_v5 = vsel %vm358_vm10, %v1103_v62, %v357_v16  ;;  %v427_v18 = vmul.f32 %v411_v47, %v1337_v36  ;;  %v428_v21 = vmul.f32 %v412_v3, %v1345_v33 }
  0x54   :  { %v355_v57 = vsel %vm1765_vm7, %v354_v43, %v352_v56  ;;  %v362_v39 = vsel %vm360_vm2, %v361_v20, %v359_v5  ;;  %v366_v61 = vsel %vm365_vm12, %v1106_v63, %v364_v51  ;;  %v371_v43 = vmul.f32 %v728_v55, %v1110_v0  ;;  %v732_v56 = vpop.eup %731 }
  0x55   :  { %v429_v16 = vmul.f32 %v413_v42, %v1356_v53  ;;  %v369_v36 = vsel %vm367_vm14, %v368_v7, %v366_v61  ;;  %v378_v33 = vmul.f32 %v730_v29, %v1113_v45  ;;  %v1601_v62 = vmul.f32 %v1425_v22, %v1367_v41  ;;  %v734_v51 = vpop.eup %733 }
  0x56   :  { %v1605_v20 = vmul.f32 %v1430_v35, %v1384_v60  ;;  %vm1766_vm5 = vcmp.eq.f32.partialorder %v1110_v0, inf  ;;  %v385_v55 = vmul.f32 %v732_v56, %v1116_v46  ;;  %v1613_v63 = vmul.f32 %v1438_v32, %v1405_v8 }
  0x57   :  { %v373_v53 = vsel %vm1766_vm5, %v1110_v0, %v371_v43  ;;  %v1617_v7 = vmul.f32 %v1443_v38, %v1416_v26  ;;  %vm1767_vm4 = vcmp.eq.f32.partialorder %v1113_v45, inf  ;;  %v392_v22 = vmul.f32 %v734_v51, %v1120_v59 }
  0x58   :  { %v376_v41 = vsel %vm374_vm0, %v375_v9, %v373_v53  ;;  %v380_v60 = vsel %vm1767_vm4, %v1113_v45, %v378_v33  ;;  %v1629_v35 = vmul.f32 %v1462_v40, %v1481_v50  ;;  %v387_v0 = vsel %vm386_vm11, %v1116_v46, %v385_v55 }
  0x59   :  { %v383_v8 = vsel %vm381_vm3, %v382_v14, %v380_v60  ;;  %v1639_v9 = vmul.f32 %v1467_v23, %v327_v6  ;;  %v1642_v26 = vmul.f32 %v1491_v12, %v334_v28  ;;  %v390_v29 = vsel %vm388_vm6, %v389_v15, %v387_v0 }
  0x5a   :  { %v394_v45 = vsel %vm393_vm1, %v1120_v59, %v392_v22  ;;  %v1651_v14 = vmul.f32 %v405_v31, %v341_v52  ;;  %v1653_v32 = vmul.f32 %v406_v1, %v348_v24  ;;  %v1768_v38 = vand.u32 2147483648, %v1120_v59 }
  0x5b   :  { %v1659_v23 = vmul.f32 %v407_v48, %v355_v57  ;;  %v1661_v50 = vmul.f32 %v408_v25, %v362_v39  ;;  %v1663_v12 = vmul.f32 %v409_v10, %v369_v36  ;;  %v1665_v46 = vmul.f32 %v410_v34, %v376_v41 }
  0x5c   :  { %v397_v40 = vsel %vm395_vm8, %v1768_v38, %v394_v45  ;;  %v1667_v15 = vmul.f32 %v411_v47, %v383_v8  ;;  %v1669_v6 = vmul.f32 %v412_v3, %v390_v29  ;;  %v446_v1 = vadd.f32 %v422_v27, %v1447_v30 }
  0x5d   :  { %v1671_v31 = vmul.f32 %v413_v42, %v397_v40  ;;  %v453_v28 = vadd.f32 %v423_v4, %v1451_v44  ;;  %v460_v59 = vadd.f32 %v424_v19, %v1471_v11  ;;  %v467_v48 = vadd.f32 %v425_v58, %v1475_v13 }
  0x5e   :  { %v474_v25 = vadd.f32 %v426_v37, %v1495_v2  ;;  %v481_v10 = vadd.f32 %v427_v18, %v1499_v49  ;;  %v488_v52 = vadd.f32 %v428_v21, %v1519_v54  ;;  %v495_v34 = vadd.f32 %v429_v16, %v1534_v17 }
  0x5f   :  { %v447_v24 = vrot.slane %v446_v1, 4  ;;  %v454_v47 = vrot.slane %v453_v28, 4  ;;  %v461_v3 = vrot.slane %v460_v59, 4  ;;  %v468_v57 = vrot.slane %v467_v48, 4 }
  0x60   :  { %v475_v5 = vrot.slane %v474_v25, 4  ;;  %v482_v30 = vrot.slane %v481_v10, 4  ;;  %v489_v27 = vrot.slane %v488_v52, 4  ;;  %v496_v44 = vrot.slane %v495_v34, 4 }
  0x61   :  { %v448_v4 = vadd.f32 %v447_v24, %v446_v1  ;;  %v455_v11 = vadd.f32 %v454_v47, %v453_v28  ;;  %v462_v19 = vadd.f32 %v461_v3, %v460_v59  ;;  %v469_v13 = vadd.f32 %v468_v57, %v467_v48 }
  0x62   :  { %v476_v58 = vadd.f32 %v475_v5, %v474_v25  ;;  %v483_v2 = vadd.f32 %v482_v30, %v481_v10  ;;  %v490_v37 = vadd.f32 %v489_v27, %v488_v52  ;;  %v497_v49 = vadd.f32 %v496_v44, %v495_v34 }
  0x63   :  { %v449_v42 = vrot.slane %v448_v4, 2  ;;  %v456_v54 = vrot.slane %v455_v11, 2  ;;  %v463_v18 = vrot.slane %v462_v19, 2  ;;  %v470_v17 = vrot.slane %v469_v13, 2 }
  0x64   :  { %v477_v21 = vrot.slane %v476_v58, 2  ;;  %v484_v39 = vrot.slane %v483_v2, 2  ;;  %v491_v61 = vrot.slane %v490_v37, 2  ;;  %v498_v43 = vrot.slane %v497_v49, 2 }
  0x65   :  { %v450_v16 = vadd.f32 %v449_v42, %v448_v4  ;;  %v457_v56 = vadd.f32 %v456_v54, %v455_v11  ;;  %v464_v36 = vadd.f32 %v463_v18, %v462_v19  ;;  %v471_v33 = vadd.f32 %v470_v17, %v469_v13 }
  0x66   :  { %v478_v51 = vadd.f32 %v477_v21, %v476_v58  ;;  %v485_v53 = vadd.f32 %v484_v39, %v483_v2  ;;  %v492_v55 = vadd.f32 %v491_v61, %v490_v37  ;;  %v499_v41 = vadd.f32 %v498_v43, %v497_v49 }
  0x67   :  { %v451_v60 = vrot.slane %v450_v16, 1  ;;  %v458_v22 = vrot.slane %v457_v56, 1  ;;  %v465_v8 = vrot.slane %v464_v36, 1  ;;  %v472_v0 = vrot.slane %v471_v33, 1 }
  0x68   :  { %v479_v29 = vrot.slane %v478_v51, 1  ;;  %v486_v45 = vrot.slane %v485_v53, 1  ;;  %v493_v38 = vrot.slane %v492_v55, 1  ;;  %v500_v40 = vrot.slane %v499_v41, 1 }
  0x69   :  { %v1681_v1 = vadd.f32 %v451_v60, %v450_v16  ;;  %v1683_v28 = vadd.f32 %v458_v22, %v457_v56  ;;  %v1685_v59 = vadd.f32 %v465_v8, %v464_v36  ;;  %v1687_v48 = vadd.f32 %v472_v0, %v471_v33 }
  0x6a   :  { %v1689_v25 = vadd.f32 %v479_v29, %v478_v51  ;;  %v1691_v10 = vadd.f32 %v486_v45, %v485_v53  ;;  %v1693_v52 = vadd.f32 %v493_v38, %v492_v55  ;;  %v1695_v34 = vadd.f32 %v500_v40, %v499_v41 }
  0x6b   :  { %v502_v24 = vadd.f32 %v1653_v32, %v1601_v62  ;;  %v509_v47 = vadd.f32 %v1659_v23, %v1605_v20  ;;  %v516_v3 = vadd.f32 %v1661_v50, %v1613_v63  ;;  %v523_v57 = vadd.f32 %v1663_v12, %v1617_v7 }
  0x6c   :  { %v530_v5 = vadd.f32 %v1665_v46, %v1629_v35  ;;  %v537_v30 = vadd.f32 %v1667_v15, %v1639_v9  ;;  %v544_v27 = vadd.f32 %v1669_v6, %v1642_v26  ;;  %v551_v62 = vadd.f32 %v1671_v31, %v1651_v14 }
  0x6d   :  { %v503_v32 = vrot.slane %v502_v24, 4  ;;  %v510_v20 = vrot.slane %v509_v47, 4  ;;  %v517_v23 = vrot.slane %v516_v3, 4  ;;  %v524_v44 = vrot.slane %v523_v57, 4 }
  0x6e   :  { %v531_v63 = vrot.slane %v530_v5, 4  ;;  %v538_v50 = vrot.slane %v537_v30, 4  ;;  %v545_v4 = vrot.slane %v544_v27, 4  ;;  %v552_v7 = vrot.slane %v551_v62, 4 }
  0x6f   :  { %v504_v12 = vadd.f32 %v503_v32, %v502_v24  ;;  %v511_v11 = vadd.f32 %v510_v20, %v509_v47  ;;  %v518_v35 = vadd.f32 %v517_v23, %v516_v3  ;;  %v525_v46 = vadd.f32 %v524_v44, %v523_v57  ;;  %v1769_v32 = vld [vmem:[#allocation2_spill] sm:$0xff] }
  0x70   :  { %v532_v19 = vadd.f32 %v531_v63, %v530_v5  ;;  %v539_v9 = vadd.f32 %v538_v50, %v537_v30  ;;  %v546_v15 = vadd.f32 %v545_v4, %v544_v27  ;;  %v553_v13 = vadd.f32 %v552_v7, %v551_v62 }
  0x71   :  { %v505_v26 = vrot.slane %v504_v12, 2  ;;  %v512_v6 = vrot.slane %v511_v11, 2  ;;  %v519_v58 = vrot.slane %v518_v35, 2  ;;  %v526_v14 = vrot.slane %v525_v46, 2 }
  0x72   :  { %v533_v31 = vrot.slane %v532_v19, 2  ;;  %v540_v2 = vrot.slane %v539_v9, 2  ;;  %v547_v37 = vrot.slane %v546_v15, 2  ;;  %v554_v49 = vrot.slane %v553_v13, 2 }
  0x73   :  { %v506_v42 = vadd.f32 %v505_v26, %v504_v12  ;;  %v513_v54 = vadd.f32 %v512_v6, %v511_v11  ;;  %v520_v18 = vadd.f32 %v519_v58, %v518_v35  ;;  %v527_v17 = vadd.f32 %v526_v14, %v525_v46 }
  0x74   :  { %v534_v21 = vadd.f32 %v533_v31, %v532_v19  ;;  %v541_v39 = vadd.f32 %v540_v2, %v539_v9  ;;  %v548_v61 = vadd.f32 %v547_v37, %v546_v15  ;;  %v555_v43 = vadd.f32 %v554_v49, %v553_v13 }
  0x75   :  { %v507_v16 = vrot.slane %v506_v42, 1  ;;  %v514_v56 = vrot.slane %v513_v54, 1  ;;  %v521_v36 = vrot.slane %v520_v18, 1  ;;  %v528_v33 = vrot.slane %v527_v17, 1 }
  0x76   :  { %v535_v51 = vrot.slane %v534_v21, 1  ;;  %v542_v53 = vrot.slane %v541_v39, 1  ;;  %v549_v55 = vrot.slane %v548_v61, 1  ;;  %v556_v41 = vrot.slane %v555_v43, 1 }
  0x77   :  { %v508_v60 = vadd.f32 %v507_v16, %v506_v42  ;;  %v515_v22 = vadd.f32 %v514_v56, %v513_v54  ;;  %v522_v8 = vadd.f32 %v521_v36, %v520_v18  ;;  %v529_v0 = vadd.f32 %v528_v33, %v527_v17 }
  0x78   :  { %v536_v29 = vadd.f32 %v535_v51, %v534_v21  ;;  %v543_v45 = vadd.f32 %v542_v53, %v541_v39  ;;  %v550_v38 = vadd.f32 %v549_v55, %v548_v61  ;;  %v557_v40 = vadd.f32 %v556_v41, %v555_v43 }
  0x79   :  { %v574_v24 = vcombine.low %v1681_v1, %v1683_v28  ;;  %v575_v47 = vcombine.low %v1685_v59, %v1687_v48  ;;  %v591_v3 = vcombine.low %v1689_v25, %v1691_v10  ;;  %v592_v57 = vcombine.low %v1693_v52, %v1695_v34 }
  0x7a   :  { %v608_v5 = vcombine.low %v508_v60, %v515_v22  ;;  %v609_v30 = vcombine.low %v522_v8, %v529_v0  ;;  %v625_v27 = vcombine.low %v536_v29, %v543_v45  ;;  %v626_v62 = vcombine.low %v550_v38, %v557_v40 }
  0x7b   :  { %v582_v20 = vrot.slane %v574_v24, %v1769_v32  ;;  %v589_v23 = vrot.slane %v575_v47, %v1769_v32  ;;  %v599_v44 = vrot.slane %v591_v3, %v1769_v32  ;;  %v606_v1 = vrot.slane %v592_v57, %v1769_v32 }
  0x7c   :  { %v616_v28 = vrot.slane %v608_v5, %v1769_v32  ;;  %v623_v59 = vrot.slane %v609_v30, %v1769_v32  ;;  %v633_v48 = vrot.slane %v625_v27, %v1769_v32  ;;  %v640_v25 = vrot.slane %v626_v62, %v1769_v32 }
  0x7d   :  { %v590_v10 = vcombine.low %v582_v20, %v589_v23  ;;  %v607_v52 = vcombine.low %v599_v44, %v606_v1  ;;  %vm647_vm13 = vcmask 1041409   ;;  %vm649_vm15 = vcmask 1043459  }
  0x7e   :  { %v624_v34 = vcombine.low %v616_v28, %v623_v59  ;;  %v641_v63 = vcombine.low %v633_v48, %v640_v25  ;;  %vm651_vm2 = vcmask 1045509   ;;  %vm653_vm12 = vcmask 1047559  }
  0x80   :  { %v646_v50 = vrot.slane %v624_v34, 7  ;;  %v657_v4 = vrot.slane %v641_v63, 7 }
  0x82   :  { %v648_v7 = vsel %vm647_vm13, %v646_v50, %v590_v10  ;;  %v658_v12 = vsel %vm647_vm13, %v657_v4, %v607_v52 }
  0x83   :  { %v650_v11 = vsel %vm649_vm15, %v646_v50, %v648_v7  ;;  %v659_v35 = vsel %vm649_vm15, %v657_v4, %v658_v12 }
  0x84   :  { %v652_v46 = vsel %vm651_vm2, %v646_v50, %v650_v11  ;;  %v660_v19 = vsel %vm651_vm2, %v657_v4, %v659_v35 }
  0x85   :  { %v654_v9 = vsel %vm653_vm12, %v646_v50, %v652_v46  ;;  %v661_v15 = vsel %vm653_vm12, %v657_v4, %v660_v19 }
  0x86   :  { %664 = vst [vmem:[%s1738_s3] sm:$0xff] %v654_v9  ;;  %665 = vst [vmem:[%s1738_s3 + $0x8] sm:$0xff] %v661_v15 }

// kernel: a_call__.5
= control target key start
LH: loop header
LB: loop body
LE: loop exit
PB: predicated region body
PF: predicated region fallthrough
CT: control target
= control target key end

     0   :  { %vm23_vm0 = vcmask 261120   ;;  %vm27_vm1 = vcmask 258048   ;;  %s125_s0 = inlined_call_operand.vmem [shape: f32[13,32], index: 0, kind: input, shape index: {}]   ;;  %s126_s1 = inlined_call_operand.vmem [shape: f32[13,32], index: 1, kind: input, shape index: {}]   ;;  %s127_s2 = inlined_call_operand.vmem [shape: f32[13,32], index: 2, kind: output, shape index: {0}]   ;;  %s128_s3 = inlined_call_operand.vmem [shape: f32[13,32], index: 3, kind: output, shape index: {1}]  }
   0x1   :  { %v13_v0 = vld [vmem:[%s125_s0] sm:$0xff]  ;;  %v14_v2 = vld [vmem:[%s125_s0 + $0x8] sm:$0x1f] }
   0x2   :  { %v15_v1 = vld [vmem:[%s126_s1] sm:$0xff]  ;;  %v17_v3 = vmul.f32 %v13_v0, %v13_v0  ;;  %v16_v5 = vld [vmem:[%s126_s1 + $0x8] sm:$0x1f]  ;;  %v18_v6 = vmul.f32 %v14_v2, %v14_v2 }
   0x3   :  { %v19_v4 = vmul.f32 %v15_v1, %v15_v1  ;;  %v20_v7 = vmul.f32 %v16_v5, %v16_v5 }
   0x5   :  { %v21_v8 = vadd.f32 %v19_v4, %v17_v3  ;;  %v22_v9 = vadd.f32 %v20_v7, %v18_v6 }
   0x7   :  { %v24_v10 = vsel %vm23_vm0, %v21_v8, 0.0  ;;  %v28_v11 = vsel %vm27_vm1, %v22_v9, 0.0 }
   0x8   :  { %25 = vadd.xlane.f32.xlu0 %v24_v10 }
   0xc   :  { %29 = vadd.xlane.f32.xlu0 %v28_v11 }
  0x91   :  { %v26_v12 = vpop.xlane.xlu0 %25 }
  0x92   :  { %67 = vrsqrt.f32 %v26_v12  ;;  %vm33_vm2 = vcmp.eq.f32.partialorder %v26_v12, inf  ;;  %v36_v16 = vand.u32 2147483648, %v26_v12  ;;  %vm35_vm3 = vcmp.eq.f32.partialorder %v26_v12, 0.0 }
  0x95   :  { %v30_v13 = vpop.xlane.xlu0 %29 }
  0x96   :  { %69 = vrsqrt.f32 %v30_v13  ;;  %vm40_vm4 = vcmp.eq.f32.partialorder %v30_v13, inf  ;;  %v43_v22 = vand.u32 2147483648, %v30_v13  ;;  %vm42_vm5 = vcmp.eq.f32.partialorder %v30_v13, 0.0 }
  0x9f   :  { %v68_v14 = vpop.eup %67 }
  0xa0   :  { %v32_v15 = vmul.f32 %v68_v14, %v26_v12 }
  0xa2   :  { %v34_v17 = vsel %vm33_vm2, %v26_v12, %v32_v15 }
  0xa3   :  { %v70_v18 = vpop.eup %69  ;;  %v37_v19 = vsel %vm35_vm3, %v36_v16, %v34_v17 }
  0xa4   :  { %v45_v20 = vmax.f32 %v37_v19, 1e-12  ;;  %v39_v21 = vmul.f32 %v70_v18, %v30_v13 }
  0xa6   :  { %71 = vrcp.f32 %v45_v20  ;;  %v41_v23 = vsel %vm40_vm4, %v30_v13, %v39_v21 }
  0xa7   :  { %v44_v24 = vsel %vm42_vm5, %v43_v22, %v41_v23 }
  0xa8   :  { %v46_v25 = vmax.f32 %v44_v24, 1e-12 }
  0xaa   :  { %73 = vrcp.f32 %v46_v25 }
  0xb3   :  { %v72_v26 = vpop.eup %71 }
  0xb4   :  { %v51_v27 = vmul.f32 %v72_v26, %v13_v0  ;;  %v55_v28 = vmul.f32 %v72_v26, %v15_v1 }
  0xb6   :  { %53 = vst.msk [vmem:[%s127_s2] sm:$0xff] %vm23_vm0, %v51_v27  ;;  %57 = vst.msk [vmem:[%s128_s3] sm:$0xff] %vm23_vm0, %v55_v28 }
  0xb7   :  { %v74_v29 = vpop.eup %73 }
  0xb8   :  { %v52_v30 = vmul.f32 %v74_v29, %v14_v2  ;;  %v56_v31 = vmul.f32 %v74_v29, %v16_v5 }
  0xba   :  { %54 = vst.msk [vmem:[%s127_s2 + $0x8] sm:$0x1f] %vm27_vm1, %v52_v30  ;;  %58 = vst.msk [vmem:[%s128_s3 + $0x8] sm:$0x1f] %vm27_vm1, %v56_v31 }

</bundles_post_ra>
